<compile_context>
chip_gen: v5e
topology: v5e:2x2
jax: 0.10.0
libtpu: 0.0.40
codegen_flags: <defaults>
</compile_context>

<pallas_src>
import jax
import jax.numpy as jnp
from jax.experimental import pallas as pl
from jax.experimental.pallas import tpu as pltpu

IN_DIM = 2
H_DIM = 400
OUT_DIM = 2

H_PAD = 512     # 400 -> 512 (4 full lane tiles)
OUT_PAD = 128   # 2   -> 128 (lane-dense output stores)


def generator_kernel(z_ref,
                     w1_ref, b1_ref,
                     w2_ref, b2_ref,
                     w3_ref, b3_ref,
                     w4_ref, b4_ref,
                     o_ref):
    z = z_ref[...].astype(jnp.float32)          # (TM, 2)
    w1 = w1_ref[...]                            # (2, H_PAD) f32

    # Layer 1: Linear(2, H) as two VPU broadcast FMAs (K=2 would waste an MXU pass).
    h = z[:, 0:1] * w1[0:1, :] + z[:, 1:2] * w1[1:2, :] + b1_ref[...]
    h = jnp.maximum(h, 0.0)                     # f32 (TM, H_PAD)

    # Layer 2: Linear(H, H) + ReLU  -- bf16 MXU, f32 accumulate, f32 elementwise.
    h = jnp.dot(h.astype(jnp.bfloat16), w2_ref[...],
                preferred_element_type=jnp.float32) + b2_ref[...]
    h = jnp.maximum(h, 0.0)

    # Layer 3: Linear(H, H) + ReLU
    h = jnp.dot(h.astype(jnp.bfloat16), w3_ref[...],
                preferred_element_type=jnp.float32) + b3_ref[...]
    h = jnp.maximum(h, 0.0)

    # Layer 4: Linear(H, 2) (padded to 128 output lanes; wrapper slices to 2).
    out = jnp.dot(h.astype(jnp.bfloat16), w4_ref[...],
                  preferred_element_type=jnp.float32) + b4_ref[...]

    o_ref[...] = out.astype(o_ref.dtype)


def init_params(key):
    """PyTorch nn.Linear default init: U(-1/sqrt(fan_in), 1/sqrt(fan_in))."""
    def linear(key, fan_in, fan_out):
        kw, kb = jax.random.split(key)
        bound = 1.0 / jnp.sqrt(fan_in)
        w = jax.random.uniform(kw, (fan_in, fan_out), jnp.float32, -bound, bound)
        b = jax.random.uniform(kb, (1, fan_out), jnp.float32, -bound, bound)
        return w, b

    k1, k2, k3, k4 = jax.random.split(key, 4)
    w1, b1 = linear(k1, IN_DIM, H_DIM)
    w2, b2 = linear(k2, H_DIM, H_DIM)
    w3, b3 = linear(k3, H_DIM, H_DIM)
    w4, b4 = linear(k4, H_DIM, OUT_DIM)
    return dict(w1=w1, b1=b1, w2=w2, b2=b2, w3=w3, b3=b3, w4=w4, b4=b4)


def pack_params(p):
    """Zero-pad to lane-aligned shapes and cast the large matmul weights to bf16.
    Call once; reuse the result across generator_forward calls."""
    w1 = jnp.zeros((IN_DIM, H_PAD), jnp.float32).at[:, :H_DIM].set(p["w1"])
    b1 = jnp.zeros((1, H_PAD), jnp.float32).at[:, :H_DIM].set(p["b1"])
    w2 = jnp.zeros((H_PAD, H_PAD), jnp.float32).at[:H_DIM, :H_DIM].set(p["w2"]).astype(jnp.bfloat16)
    b2 = jnp.zeros((1, H_PAD), jnp.float32).at[:, :H_DIM].set(p["b2"])
    w3 = jnp.zeros((H_PAD, H_PAD), jnp.float32).at[:H_DIM, :H_DIM].set(p["w3"]).astype(jnp.bfloat16)
    b3 = jnp.zeros((1, H_PAD), jnp.float32).at[:, :H_DIM].set(p["b3"])
    w4 = jnp.zeros((H_PAD, OUT_PAD), jnp.float32).at[:H_DIM, :OUT_DIM].set(p["w4"]).astype(jnp.bfloat16)
    b4 = jnp.zeros((1, OUT_PAD), jnp.float32).at[:, :OUT_DIM].set(p["b4"])
    return (w1, b1, w2, b2, w3, b3, w4, b4)


def generator_forward(z, packed):
    """z: (B, 2) float32.  packed: output of pack_params."""
    w1, b1, w2, b2, w3, b3, w4, b4 = packed
    B = z.shape[0]

    # Batch tile: up to 256 rows (feeds the MXU M dim well on v6e/v7x, fine on v5e).
    TM = min(256, ((B + 7) // 8) * 8)
    B_pad = ((B + TM - 1) // TM) * TM
    if B_pad != B:
        z = jnp.pad(z, ((0, B_pad - B), (0, 0)))

    grid = (B_pad // TM,)

    in_specs = [
        pl.BlockSpec((TM, IN_DIM), lambda i: (i, 0)),        # z: tiled over batch
        pl.BlockSpec((IN_DIM, H_PAD), lambda i: (0, 0)),     # weights/biases: resident
        pl.BlockSpec((1, H_PAD), lambda i: (0, 0)),
        pl.BlockSpec((H_PAD, H_PAD), lambda i: (0, 0)),
        pl.BlockSpec((1, H_PAD), lambda i: (0, 0)),
        pl.BlockSpec((H_PAD, H_PAD), lambda i: (0, 0)),
        pl.BlockSpec((1, H_PAD), lambda i: (0, 0)),
        pl.BlockSpec((H_PAD, OUT_PAD), lambda i: (0, 0)),
        pl.BlockSpec((1, OUT_PAD), lambda i: (0, 0)),
    ]

    out = pl.pallas_call(
        generator_kernel,
        out_shape=jax.ShapeDtypeStruct((B_pad, OUT_PAD), jnp.float32),
        grid=grid,
        in_specs=in_specs,
        out_specs=pl.BlockSpec((TM, OUT_PAD), lambda i: (i, 0)),
        compiler_params=pltpu.CompilerParams(
            dimension_semantics=("parallel",)),  # shards batch tiles across v7x TCs
    )(z, w1, b1, w2, b2, w3, b3, w4, b4)

    return out[:B, :OUT_DIM]


def generator_reference_f32(z, p):
    """Pure f32, unpadded reference (original module semantics)."""
    h = jnp.maximum(z @ p["w1"] + p["b1"], 0.0)
    h = jnp.maximum(h @ p["w2"] + p["b2"], 0.0)
    h = jnp.maximum(h @ p["w3"] + p["b3"], 0.0)
    return h @ p["w4"] + p["b4"]


def generator_reference_packed(z, packed):
    """Reference that mimics the kernel numerics (bf16 MXU inputs, f32 accumulate)."""
    w1, b1, w2, b2, w3, b3, w4, b4 = packed
    h = jnp.maximum(z[:, 0:1] * w1[0:1, :] + z[:, 1:2] * w1[1:2, :] + b1, 0.0)
    h = jnp.maximum(jnp.dot(h.astype(jnp.bfloat16), w2,
                            preferred_element_type=jnp.float32) + b2, 0.0)
    h = jnp.maximum(jnp.dot(h.astype(jnp.bfloat16), w3,
                            preferred_element_type=jnp.float32) + b3, 0.0)
    out = jnp.dot(h.astype(jnp.bfloat16), w4,
                  preferred_element_type=jnp.float32) + b4
    return out[:, :OUT_DIM]


if __name__ == "__main__":
    key = jax.random.PRNGKey(0)
    k_params, k_z = jax.random.split(key)

    params = init_params(k_params)
    packed = pack_params(params)          # pad / cast once, reuse every call

    batch = 8
    z = jax.random.normal(k_z, (batch, IN_DIM), jnp.float32)

    out = generator_forward(z, packed)
    out = jax.block_until_ready(out)
    assert out.shape == (batch, OUT_DIM), out.shape

    # Exact-path check (same bf16 numerics as the kernel).
    ref_bf16 = generator_reference_packed(z, packed)
    assert jnp.allclose(out, ref_bf16, atol=1e-2, rtol=1e-2), "mismatch vs bf16 reference"

    # Semantics check against the original full-f32 module (bf16 weights => loose tol).
    ref_f32 = generator_reference_f32(z, params)
    assert jnp.allclose(out, ref_f32, atol=5e-2, rtol=5e-2), "mismatch vs f32 reference"

    print("KERNEL_OK")
</pallas_src>

<mosaic_0001>
module attributes {stable_mosaic.version = 11 : i64} {
  func.func @generator_kernel(%arg0: i32, %arg1: memref<8x2xf32, #tpu.memory_space<vmem>>, %arg2: memref<2x512xf32, #tpu.memory_space<vmem>>, %arg3: memref<1x512xf32, #tpu.memory_space<vmem>>, %arg4: memref<512x512xbf16, #tpu.memory_space<vmem>>, %arg5: memref<1x512xf32, #tpu.memory_space<vmem>>, %arg6: memref<512x512xbf16, #tpu.memory_space<vmem>>, %arg7: memref<1x512xf32, #tpu.memory_space<vmem>>, %arg8: memref<512x128xbf16, #tpu.memory_space<vmem>>, %arg9: memref<1x128xf32, #tpu.memory_space<vmem>>, %arg10: memref<8x128xf32, #tpu.memory_space<vmem>>) attributes {dimension_semantics = [#tpu.dimension_semantics<parallel>], iteration_bounds = array<i64: 1>, scalar_prefetch = 0 : i64, scratch_operands = 0 : i64, tpu.core_type = #tpu.core_type<tc>, window_params = [{transform_indices = @transform_0, window_bounds = array<i64: 8, 2>}, {pipeline_mode = #tpu.pipeline_mode<synchronous>, transform_indices = @transform_1, window_bounds = array<i64: 2, 512>}, {pipeline_mode = #tpu.pipeline_mode<synchronous>, transform_indices = @transform_2, window_bounds = array<i64: 1, 512>}, {pipeline_mode = #tpu.pipeline_mode<synchronous>, transform_indices = @transform_3, window_bounds = array<i64: 512, 512>}, {pipeline_mode = #tpu.pipeline_mode<synchronous>, transform_indices = @transform_4, window_bounds = array<i64: 1, 512>}, {pipeline_mode = #tpu.pipeline_mode<synchronous>, transform_indices = @transform_5, window_bounds = array<i64: 512, 512>}, {pipeline_mode = #tpu.pipeline_mode<synchronous>, transform_indices = @transform_6, window_bounds = array<i64: 1, 512>}, {pipeline_mode = #tpu.pipeline_mode<synchronous>, transform_indices = @transform_7, window_bounds = array<i64: 512, 128>}, {pipeline_mode = #tpu.pipeline_mode<synchronous>, transform_indices = @transform_8, window_bounds = array<i64: 1, 128>}, {transform_indices = @transform_9, window_bounds = array<i64: 8, 128>}]} {
    %c0 = arith.constant 0 : index
    %c0_0 = arith.constant 0 : index
    %0 = vector.load %arg1[%c0, %c0_0] : memref<8x2xf32, #tpu.memory_space<vmem>>, vector<8x2xf32>
    %c0_1 = arith.constant 0 : index
    %c0_2 = arith.constant 0 : index
    %1 = vector.load %arg2[%c0_1, %c0_2] : memref<2x512xf32, #tpu.memory_space<vmem>>, vector<2x512xf32>
    %2 = vector.extract_strided_slice %0 {offsets = [0, 0], sizes = [8, 1], strides = [1, 1]} : vector<8x2xf32> to vector<8x1xf32>
    %3 = vector.extract_strided_slice %1 {offsets = [0, 0], sizes = [1, 512], strides = [1, 1]} : vector<2x512xf32> to vector<1x512xf32>
    %4 = vector.broadcast %2 : vector<8x1xf32> to vector<8x512xf32>
    %5 = vector.broadcast %3 : vector<1x512xf32> to vector<8x512xf32>
    %6 = arith.mulf %4, %5 : vector<8x512xf32>
    %7 = vector.extract_strided_slice %0 {offsets = [0, 1], sizes = [8, 1], strides = [1, 1]} : vector<8x2xf32> to vector<8x1xf32>
    %8 = vector.extract_strided_slice %1 {offsets = [1, 0], sizes = [1, 512], strides = [1, 1]} : vector<2x512xf32> to vector<1x512xf32>
    %9 = vector.broadcast %7 : vector<8x1xf32> to vector<8x512xf32>
    %10 = vector.broadcast %8 : vector<1x512xf32> to vector<8x512xf32>
    %11 = arith.mulf %9, %10 : vector<8x512xf32>
    %12 = arith.addf %6, %11 : vector<8x512xf32>
    %c0_3 = arith.constant 0 : index
    %c0_4 = arith.constant 0 : index
    %13 = vector.load %arg3[%c0_3, %c0_4] : memref<1x512xf32, #tpu.memory_space<vmem>>, vector<1x512xf32>
    %14 = vector.broadcast %13 : vector<1x512xf32> to vector<8x512xf32>
    %15 = arith.addf %12, %14 : vector<8x512xf32>
    %cst = arith.constant 0.000000e+00 : f32
    %16 = vector.broadcast %cst : f32 to vector<8x512xf32>
    %17 = arith.maximumf %15, %16 : vector<8x512xf32>
    %18 = arith.truncf %17 : vector<8x512xf32> to vector<8x512xbf16>
    %c0_5 = arith.constant 0 : index
    %c0_6 = arith.constant 0 : index
    %19 = vector.load %arg4[%c0_5, %c0_6] : memref<512x512xbf16, #tpu.memory_space<vmem>>, vector<512x512xbf16>
    %cst_7 = arith.constant dense<0.000000e+00> : vector<8x512xf32>
    %20 = tpu.matmul %18, %19, %cst_7 {dimension_numbers = #tpu.dot_dimension_numbers<[1], [0], [0], [1], [0, 0, 1, 1], [], []>} : vector<8x512xbf16>, vector<512x512xbf16>, vector<8x512xf32> -> vector<8x512xf32>
    %c0_8 = arith.constant 0 : index
    %c0_9 = arith.constant 0 : index
    %21 = vector.load %arg5[%c0_8, %c0_9] : memref<1x512xf32, #tpu.memory_space<vmem>>, vector<1x512xf32>
    %22 = vector.broadcast %21 : vector<1x512xf32> to vector<8x512xf32>
    %23 = arith.addf %20, %22 : vector<8x512xf32>
    %cst_10 = arith.constant 0.000000e+00 : f32
    %24 = vector.broadcast %cst_10 : f32 to vector<8x512xf32>
    %25 = arith.maximumf %23, %24 : vector<8x512xf32>
    %26 = arith.truncf %25 : vector<8x512xf32> to vector<8x512xbf16>
    %c0_11 = arith.constant 0 : index
    %c0_12 = arith.constant 0 : index
    %27 = vector.load %arg6[%c0_11, %c0_12] : memref<512x512xbf16, #tpu.memory_space<vmem>>, vector<512x512xbf16>
    %cst_13 = arith.constant dense<0.000000e+00> : vector<8x512xf32>
    %28 = tpu.matmul %26, %27, %cst_13 {dimension_numbers = #tpu.dot_dimension_numbers<[1], [0], [0], [1], [0, 0, 1, 1], [], []>} : vector<8x512xbf16>, vector<512x512xbf16>, vector<8x512xf32> -> vector<8x512xf32>
    %c0_14 = arith.constant 0 : index
    %c0_15 = arith.constant 0 : index
    %29 = vector.load %arg7[%c0_14, %c0_15] : memref<1x512xf32, #tpu.memory_space<vmem>>, vector<1x512xf32>
    %30 = vector.broadcast %29 : vector<1x512xf32> to vector<8x512xf32>
    %31 = arith.addf %28, %30 : vector<8x512xf32>
    %cst_16 = arith.constant 0.000000e+00 : f32
    %32 = vector.broadcast %cst_16 : f32 to vector<8x512xf32>
    %33 = arith.maximumf %31, %32 : vector<8x512xf32>
    %34 = arith.truncf %33 : vector<8x512xf32> to vector<8x512xbf16>
    %c0_17 = arith.constant 0 : index
    %c0_18 = arith.constant 0 : index
    %35 = vector.load %arg8[%c0_17, %c0_18] : memref<512x128xbf16, #tpu.memory_space<vmem>>, vector<512x128xbf16>
    %cst_19 = arith.constant dense<0.000000e+00> : vector<8x128xf32>
    %36 = tpu.matmul %34, %35, %cst_19 {dimension_numbers = #tpu.dot_dimension_numbers<[1], [0], [0], [1], [0, 0, 1, 1], [], []>} : vector<8x512xbf16>, vector<512x128xbf16>, vector<8x128xf32> -> vector<8x128xf32>
    %c0_20 = arith.constant 0 : index
    %c0_21 = arith.constant 0 : index
    %37 = vector.load %arg9[%c0_20, %c0_21] : memref<1x128xf32, #tpu.memory_space<vmem>>, vector<1x128xf32>
    %38 = vector.broadcast %37 : vector<1x128xf32> to vector<8x128xf32>
    %39 = arith.addf %36, %38 : vector<8x128xf32>
    %c0_22 = arith.constant 0 : index
    %c0_23 = arith.constant 0 : index
    %40 = vector.load %arg10[%c0_22, %c0_23] : memref<8x128xf32, #tpu.memory_space<vmem>>, vector<8x128xf32>
    tpu.vector_store %arg10[%c0_22, %c0_23], %39 {strides = array<i32>} : memref<8x128xf32, #tpu.memory_space<vmem>>, vector<8x128xf32>,
    return
  }
  func.func @transform_0(%arg0: i32) -> (i32, i32) {
    %c0_i32 = arith.constant 0 : i32
    %c0_i32_0 = arith.constant 0 : i32
    return %arg0, %c0_i32 : i32, i32
  }
  func.func @transform_1(%arg0: i32) -> (i32, i32) {
    %c0_i32 = arith.constant 0 : i32
    %c0_i32_0 = arith.constant 0 : i32
    %c0_i32_1 = arith.constant 0 : i32
    return %c0_i32, %c0_i32_0 : i32, i32
  }
  func.func @transform_2(%arg0: i32) -> (i32, i32) {
    %c0_i32 = arith.constant 0 : i32
    %c0_i32_0 = arith.constant 0 : i32
    %c0_i32_1 = arith.constant 0 : i32
    return %c0_i32, %c0_i32_0 : i32, i32
  }
  func.func @transform_3(%arg0: i32) -> (i32, i32) {
    %c0_i32 = arith.constant 0 : i32
    %c0_i32_0 = arith.constant 0 : i32
    %c0_i32_1 = arith.constant 0 : i32
    return %c0_i32, %c0_i32_0 : i32, i32
  }
  func.func @transform_4(%arg0: i32) -> (i32, i32) {
    %c0_i32 = arith.constant 0 : i32
    %c0_i32_0 = arith.constant 0 : i32
    %c0_i32_1 = arith.constant 0 : i32
    return %c0_i32, %c0_i32_0 : i32, i32
  }
  func.func @transform_5(%arg0: i32) -> (i32, i32) {
    %c0_i32 = arith.constant 0 : i32
    %c0_i32_0 = arith.constant 0 : i32
    %c0_i32_1 = arith.constant 0 : i32
    return %c0_i32, %c0_i32_0 : i32, i32
  }
  func.func @transform_6(%arg0: i32) -> (i32, i32) {
    %c0_i32 = arith.constant 0 : i32
    %c0_i32_0 = arith.constant 0 : i32
    %c0_i32_1 = arith.constant 0 : i32
    return %c0_i32, %c0_i32_0 : i32, i32
  }
  func.func @transform_7(%arg0: i32) -> (i32, i32) {
    %c0_i32 = arith.constant 0 : i32
    %c0_i32_0 = arith.constant 0 : i32
    %c0_i32_1 = arith.constant 0 : i32
    return %c0_i32, %c0_i32_0 : i32, i32
  }
  func.func @transform_8(%arg0: i32) -> (i32, i32) {
    %c0_i32 = arith.constant 0 : i32
    %c0_i32_0 = arith.constant 0 : i32
    %c0_i32_1 = arith.constant 0 : i32
    return %c0_i32, %c0_i32_0 : i32, i32
  }
  func.func @transform_9(%arg0: i32) -> (i32, i32) {
    %c0_i32 = arith.constant 0 : i32
    %c0_i32_0 = arith.constant 0 : i32
    return %arg0, %c0_i32 : i32, i32
  }
}

</mosaic_0001>

<bundles_post_ra>
// kernel: tpu_custom_call.1
= control target key start
LH: loop header
LB: loop body
LE: loop exit
PB: predicated region body
PF: predicated region fallthrough
CT: control target
= control target key end

     0   :  { %14 = vsyncpa [#allocation3], 0  ;;  %s4268_s0 = inlined_call_operand.vmem [shape: f32[8,2], index: 0, kind: input, shape index: {}]   ;;  %s4269_s1 = inlined_call_operand.vmem [shape: f32[2,512], index: 1, kind: input, shape index: {}]   ;;  %s4270_s2 = inlined_call_operand.hbm [shape: f32[1,512], index: 2, kind: input, shape index: {}]   ;;  %s4271_s3 = inlined_call_operand.hbm [shape: bf16[512,512], index: 3, kind: input, shape index: {}]   ;;  %s4272_s4 = inlined_call_operand.vmem [shape: f32[1,512], index: 4, kind: input, shape index: {}]   ;;  %s4273_s5 = inlined_call_operand.hbm [shape: bf16[512,512], index: 5, kind: input, shape index: {}]   ;;  %s4274_s6 = inlined_call_operand.hbm [shape: f32[1,512], index: 6, kind: input, shape index: {}]   ;;  %s4275_s7 = inlined_call_operand.hbm [shape: bf16[512,128], index: 7, kind: input, shape index: {}]   ;;  %s4276_s8 = inlined_call_operand.vmem [shape: f32[1,128], index: 8, kind: input, shape index: {}]   ;;  %s4277_s9 = inlined_call_operand.hbm [shape: f32[8,128], index: 9, kind: output, shape index: {}]  }
   0x1   :  { %15 = vsyncpa [#allocation6], 0 }
   0x2   :  { %16 = vsyncpa [#allocation9], 0  ;;  %s37_s11 = sshll.u32 %s4271_s3, 4  ;;  %s38_s11 = int_to_ptr.hbm [resolvable:$true] %s37_s11 }
   0x3   :  { %17 = vsyncpa [#allocation4], 0  ;;  %s4104_s12 = smov [#allocation5]   ;;  %s66_s16 = sshll.u32 %s4274_s6, 4  ;;  %s67_s16 = int_to_ptr.hbm [resolvable:$true] %s66_s16 }
   0x4   :  { %s39_s13 = sshll.u32 %s4104_s12, 4  ;;  %s4105_s17 = smov 256   ;;  %s40_s13 = int_to_ptr.vmem [resolvable:$true] %s39_s13 }
   0x5   :  { %s4106_s18 = smov 16   ;;  %s4107_s19 = smov [#allocation8]  }
   0x6   :  { %45 = dma.hbm_to_vmem [thread:$0]  %s38_s11, 16384, %s40_s13, [#allocation6], %s4105_s17, %s4105_s17, %s4106_s18  }
   0x7   :  { %s68_s20 = sshll.u32 %s4107_s19, 4  ;;  %s27_s23 = sshll.u32 %s4270_s2, 4  ;;  %s69_s20 = int_to_ptr.vmem [resolvable:$true] %s68_s20  ;;  %s28_s23 = int_to_ptr.hbm [resolvable:$true] %s27_s23 }
   0x8   :  { %71 = dma.hbm_to_vmem [thread:$0]  %s67_s16, 64, %s69_s20, [#allocation9]  }
   0x9   :  { %s52_s25 = sshll.u32 %s4273_s5, 4  ;;  %s4108_s26 = smov [#allocation2]   ;;  %s53_s25 = int_to_ptr.hbm [resolvable:$true] %s52_s25 }
   0xa   :  { %s29_s27 = sshll.u32 %s4108_s26, 4  ;;  %s4109_s6 = smov [#allocation7]   ;;  %s30_s27 = int_to_ptr.vmem [resolvable:$true] %s29_s27 }
   0xb   :  { %32 = dma.hbm_to_vmem [thread:$0]  %s28_s23, 64, %s30_s27, [#allocation3]  }
   0xc   :  { %s54_s28 = sshll.u32 %s4109_s6, 4  ;;  %s76_s10 = sshll.u32 %s4275_s7, 4  ;;  %s55_s28 = int_to_ptr.vmem [resolvable:$true] %s54_s28  ;;  %s77_s10 = int_to_ptr.hbm [resolvable:$true] %s76_s10 }
   0xd   :  { %60 = dma.hbm_to_vmem [thread:$0]  %s53_s25, 16384, %s55_s28, [#allocation6], %s4105_s17, %s4105_s17, %s4106_s18  }
   0xe   :  { %s4110_s2 = smov [#allocation10]   ;;  %s4111_s12 = smov 64  }
   0xf   :  { %s78_s11 = sshll.u32 %s4110_s2, 4  ;;  %s4112_s13 = smov 4   ;;  %s79_s11 = int_to_ptr.vmem [resolvable:$true] %s78_s11 }
  0x10   :  { %84 = dma.hbm_to_vmem [thread:$0]  %s77_s10, 4096, %s79_s11, [#allocation9], %s4111_s12, %s4111_s12, %s4112_s13  }
  0x11   :  { %4096 = dma.done.wait [#allocation3], 64  }
  0x12   :  { %4097 = vsyncadd [#allocation3], 4294967232 }
  0x13   :  { %4098 = dma.done.wait [#allocation6], 32768  }
  0x14   :  { %4099 = vsyncadd [#allocation6], 4294934528 }
  0x15   :  { %4100 = dma.done.wait [#allocation9], 4160  }
  0x16   :  { %4101 = vsyncadd [#allocation9], 4294963136  ;;  %v4113_v0 = vmov 0   ;;  %v107_v1 = vld [vmem:[%s4268_s0] sm:$0xff]  ;;  %v3679_v3 = vld [vmem:[#allocation5 + $0xec] sm:$0xf0] }
  0x17   :  { %3949 = vset.pattern.permute.xlu0 %v4113_v0  ;;  %v2611_v2 = vld [vmem:[#allocation5 + $0xe0] sm:$0xf]  ;;  %v3711_v6 = vld [vmem:[#allocation5 + $0x1ec] sm:$0xf0]  ;;  %v4114_v38 = vmov 1   ;;  %s4115_s17 = smov [#allocation11]  }
  0x18   :  { %111 = vperm.xlu0 %3949, %v107_v1   ;;  %v2612_v4 = vor.u32 %v3679_v3, %v2611_v2  ;;  %v2739_v5 = vld [vmem:[#allocation5 + $0x1e0] sm:$0xf]  ;;  %v3743_v9 = vld [vmem:[#allocation5 + $0x2ec] sm:$0xf0]  ;;  %s2483_s18 = sshll.u32 %s4115_s17, 4  ;;  %s2485_s21 = sshll.u32 %s4277_s9, 4  ;;  %s2484_s18 = int_to_ptr.vmem [resolvable:$true] %s2483_s18  ;;  %s2486_s21 = int_to_ptr.hbm [resolvable:$true] %s2485_s21 }
  0x19   :  { %v2867_v7 = vld [vmem:[#allocation5 + $0x2e0] sm:$0xf]  ;;  %v2740_v8 = vor.u32 %v3711_v6, %v2739_v5  ;;  %v3775_v11 = vld [vmem:[#allocation5 + $0x3ec] sm:$0xf0] }
  0x1a   :  { %v2995_v10 = vld [vmem:[#allocation5 + $0x3e0] sm:$0xf]  ;;  %955 = vmatpush.bf16.msra.mxu0 %v2612_v4  ;;  %v2868_v12 = vor.u32 %v3743_v9, %v2867_v7  ;;  %v3675_v15 = vld [vmem:[#allocation5 + $0xcc] sm:$0xf0] }
  0x1b   :  { %v2996_v13 = vor.u32 %v3775_v11, %v2995_v10  ;;  %v2595_v14 = vld [vmem:[#allocation5 + $0xc0] sm:$0xf]  ;;  %968 = vmatpush.bf16.msra.mxu1 %v2740_v8  ;;  %v3707_v18 = vld [vmem:[#allocation5 + $0x1cc] sm:$0xf0] }
  0x1c   :  { %v2723_v16 = vld [vmem:[#allocation5 + $0x1c0] sm:$0xf]  ;;  %v2596_v17 = vor.u32 %v3675_v15, %v2595_v14  ;;  %v3739_v20 = vld [vmem:[#allocation5 + $0x2cc] sm:$0xf0]  ;;  %981 = vmatpush.bf16.msra.mxu2 %v2868_v12 }
  0x1d   :  { %v2851_v19 = vld [vmem:[#allocation5 + $0x2c0] sm:$0xf]  ;;  %994 = vmatpush.bf16.msra.mxu3 %v2996_v13  ;;  %v2724_v21 = vor.u32 %v3707_v18, %v2723_v16  ;;  %v3771_v24 = vld [vmem:[#allocation5 + $0x3cc] sm:$0xf0] }
  0x1e   :  { %v2852_v22 = vor.u32 %v3739_v20, %v2851_v19  ;;  %v2979_v23 = vld [vmem:[#allocation5 + $0x3c0] sm:$0xf]  ;;  %v3671_v27 = vld [vmem:[#allocation5 + $0xac] sm:$0xf0]  ;;  %956 = vmatpush.bf16.msra.mxu0 %v2596_v17 }
  0x1f   :  { %v2579_v25 = vld [vmem:[#allocation5 + $0xa0] sm:$0xf]  ;;  %v2980_v26 = vor.u32 %v3771_v24, %v2979_v23  ;;  %v3703_v29 = vld [vmem:[#allocation5 + $0x1ac] sm:$0xf0]  ;;  %969 = vmatpush.bf16.msra.mxu1 %v2724_v21 }
  0x20   :  { %v2707_v28 = vld [vmem:[#allocation5 + $0x1a0] sm:$0xf]  ;;  %v2580_v30 = vor.u32 %v3671_v27, %v2579_v25  ;;  %v3735_v32 = vld [vmem:[#allocation5 + $0x2ac] sm:$0xf0]  ;;  %3950 = vset.pattern.permute.xlu0 %v4114_v38  ;;  %982 = vmatpush.bf16.msra.mxu2 %v2852_v22 }
  0x21   :  { %v2835_v31 = vld [vmem:[#allocation5 + $0x2a0] sm:$0xf]  ;;  %v2708_v34 = vor.u32 %v3703_v29, %v2707_v28  ;;  %v3767_v35 = vld [vmem:[#allocation5 + $0x3ac] sm:$0xf0]  ;;  %132 = vperm.xlu0 %3950, %v107_v1   ;;  %995 = vmatpush.bf16.msra.mxu3 %v2980_v26  ;;  %v3677_v28 = vld [vmem:[#allocation5 + $0xe4] sm:$0xf] }
  0x22   :  { %v2963_v33 = vld [vmem:[#allocation5 + $0x3a0] sm:$0xf]  ;;  %v3667_v37 = vld [vmem:[#allocation5 + $0x8c] sm:$0xf0]  ;;  %v2836_v39 = vor.u32 %v3735_v32, %v2835_v31  ;;  %957 = vmatpush.bf16.msra.mxu0 %v2580_v30  ;;  %v2613_v29 = vld [vmem:[#allocation5 + $0xf0] sm:$0xf0] }
  0x23   :  { %v2563_v36 = vld [vmem:[#allocation5 + $0x80] sm:$0xf]  ;;  %v3699_v41 = vld [vmem:[#allocation5 + $0x18c] sm:$0xf0]  ;;  %v2964_v42 = vor.u32 %v3767_v35, %v2963_v33  ;;  %970 = vmatpush.bf16.msra.mxu1 %v2708_v34  ;;  %v3709_v32 = vld [vmem:[#allocation5 + $0x1e4] sm:$0xf] }
  0x24   :  { %v2691_v40 = vld [vmem:[#allocation5 + $0x180] sm:$0xf]  ;;  %v3731_v44 = vld [vmem:[#allocation5 + $0x28c] sm:$0xf0]  ;;  %v2564_v45 = vor.u32 %v3667_v37, %v2563_v36  ;;  %983 = vmatpush.bf16.msra.mxu2 %v2836_v39  ;;  %v2741_v33 = vld [vmem:[#allocation5 + $0x1f0] sm:$0xf0]  ;;  %v2616_v39 = vor.u32 %v3677_v28, %v2613_v29 }
  0x25   :  { %v2819_v43 = vld [vmem:[#allocation5 + $0x280] sm:$0xf]  ;;  %v3763_v47 = vld [vmem:[#allocation5 + $0x38c] sm:$0xf0]  ;;  %v2692_v48 = vor.u32 %v3699_v41, %v2691_v40  ;;  %996 = vmatpush.bf16.msra.mxu3 %v2964_v42  ;;  %v3741_v36 = vld [vmem:[#allocation5 + $0x2e4] sm:$0xf] }
  0x26   :  { %v2947_v46 = vld [vmem:[#allocation5 + $0x380] sm:$0xf]  ;;  %v3663_v50 = vld [vmem:[#allocation5 + $0x6c] sm:$0xf0]  ;;  %v2820_v51 = vor.u32 %v3731_v44, %v2819_v43  ;;  %958 = vmatpush.bf16.msra.mxu0 %v2564_v45  ;;  %v2869_v37 = vld [vmem:[#allocation5 + $0x2f0] sm:$0xf0]  ;;  %v2744_v43 = vor.u32 %v3709_v32, %v2741_v33 }
  0x27   :  { %v2547_v49 = vld [vmem:[#allocation5 + $0x60] sm:$0xf]  ;;  %v3695_v53 = vld [vmem:[#allocation5 + $0x16c] sm:$0xf0]  ;;  %v2948_v54 = vor.u32 %v3763_v47, %v2947_v46  ;;  %971 = vmatpush.bf16.msra.mxu1 %v2692_v48  ;;  %v3773_v40 = vld [vmem:[#allocation5 + $0x3e4] sm:$0xf]  ;;  %v2872_v47 = vor.u32 %v3741_v36, %v2869_v37 }
  0x28   :  { %v2675_v52 = vld [vmem:[#allocation5 + $0x160] sm:$0xf]  ;;  %v3727_v56 = vld [vmem:[#allocation5 + $0x26c] sm:$0xf0]  ;;  %v2548_v57 = vor.u32 %v3663_v50, %v2547_v49  ;;  %984 = vmatpush.bf16.msra.mxu2 %v2820_v51  ;;  %v2997_v41 = vld [vmem:[#allocation5 + $0x3f0] sm:$0xf0] }
  0x29   :  { %v2803_v55 = vld [vmem:[#allocation5 + $0x260] sm:$0xf]  ;;  %v3759_v59 = vld [vmem:[#allocation5 + $0x36c] sm:$0xf0]  ;;  %v2676_v60 = vor.u32 %v3695_v53, %v2675_v52  ;;  %997 = vmatpush.bf16.msra.mxu3 %v2948_v54  ;;  %v3673_v44 = vld [vmem:[#allocation5 + $0xc4] sm:$0xf]  ;;  %v3000_v50 = vor.u32 %v3773_v40, %v2997_v41 }
  0x2a   :  { %v2931_v58 = vld [vmem:[#allocation5 + $0x360] sm:$0xf]  ;;  %v3659_v62 = vld [vmem:[#allocation5 + $0x4c] sm:$0xf0]  ;;  %v2804_v63 = vor.u32 %v3727_v56, %v2803_v55  ;;  %959 = vmatpush.bf16.msra.mxu0 %v2548_v57  ;;  %v2597_v45 = vld [vmem:[#allocation5 + $0xd0] sm:$0xf0] }
  0x2b   :  { %v2531_v61 = vld [vmem:[#allocation5 + $0x40] sm:$0xf]  ;;  %v3691_v1 = vld [vmem:[#allocation5 + $0x14c] sm:$0xf0]  ;;  %v2932_v2 = vor.u32 %v3759_v59, %v2931_v58  ;;  %972 = vmatpush.bf16.msra.mxu1 %v2676_v60  ;;  %v3705_v48 = vld [vmem:[#allocation5 + $0x1c4] sm:$0xf]  ;;  %v2600_v53 = vor.u32 %v3673_v44, %v2597_v45 }
  0x2c   :  { %v2659_v0 = vld [vmem:[#allocation5 + $0x140] sm:$0xf]  ;;  %v3723_v4 = vld [vmem:[#allocation5 + $0x24c] sm:$0xf0]  ;;  %v2532_v5 = vor.u32 %v3659_v62, %v2531_v61  ;;  %985 = vmatpush.bf16.msra.mxu2 %v2804_v63  ;;  %v2725_v49 = vld [vmem:[#allocation5 + $0x1d0] sm:$0xf0] }
  0x2d   :  { %v2787_v3 = vld [vmem:[#allocation5 + $0x240] sm:$0xf]  ;;  %v3755_v7 = vld [vmem:[#allocation5 + $0x34c] sm:$0xf0]  ;;  %v2660_v8 = vor.u32 %v3691_v1, %v2659_v0  ;;  %998 = vmatpush.bf16.msra.mxu3 %v2932_v2  ;;  %v3737_v51 = vld [vmem:[#allocation5 + $0x2c4] sm:$0xf]  ;;  %v2728_v56 = vor.u32 %v3705_v48, %v2725_v49 }
  0x2e   :  { %v2915_v6 = vld [vmem:[#allocation5 + $0x340] sm:$0xf]  ;;  %v3655_v10 = vld [vmem:[#allocation5 + $0x2c] sm:$0xf0]  ;;  %v2788_v11 = vor.u32 %v3723_v4, %v2787_v3  ;;  %960 = vmatpush.bf16.msra.mxu0 %v2532_v5  ;;  %v2853_v52 = vld [vmem:[#allocation5 + $0x2d0] sm:$0xf0] }
  0x2f   :  { %v2515_v9 = vld [vmem:[#allocation5 + $0x20] sm:$0xf]  ;;  %v3687_v13 = vld [vmem:[#allocation5 + $0x12c] sm:$0xf0]  ;;  %v2916_v14 = vor.u32 %v3755_v7, %v2915_v6  ;;  %973 = vmatpush.bf16.msra.mxu1 %v2660_v8  ;;  %v3769_v54 = vld [vmem:[#allocation5 + $0x3c4] sm:$0xf]  ;;  %v2856_v59 = vor.u32 %v3737_v51, %v2853_v52 }
  0x30   :  { %v2643_v12 = vld [vmem:[#allocation5 + $0x120] sm:$0xf]  ;;  %v3719_v16 = vld [vmem:[#allocation5 + $0x22c] sm:$0xf0]  ;;  %v2516_v18 = vor.u32 %v3655_v10, %v2515_v9  ;;  %986 = vmatpush.bf16.msra.mxu2 %v2788_v11  ;;  %v2981_v55 = vld [vmem:[#allocation5 + $0x3d0] sm:$0xf0] }
  0x31   :  { %v2771_v15 = vld [vmem:[#allocation5 + $0x220] sm:$0xf]  ;;  %v3751_v19 = vld [vmem:[#allocation5 + $0x32c] sm:$0xf0]  ;;  %v2644_v22 = vor.u32 %v3687_v13, %v2643_v12  ;;  %999 = vmatpush.bf16.msra.mxu3 %v2916_v14  ;;  %v3669_v57 = vld [vmem:[#allocation5 + $0xa4] sm:$0xf]  ;;  %v2984_v62 = vor.u32 %v3769_v54, %v2981_v55 }
  0x32   :  { %v2899_v17 = vld [vmem:[#allocation5 + $0x320] sm:$0xf]  ;;  %v3651_v21 = vld [vmem:[#allocation5 + $0xc] sm:$0xf0]  ;;  %v2772_v26 = vor.u32 %v3719_v16, %v2771_v15  ;;  %961 = vmatpush.bf16.msra.mxu0 %v2516_v18  ;;  %v2581_v58 = vld [vmem:[#allocation5 + $0xb0] sm:$0xf0] }
  0x33   :  { %v2499_v20 = vld [vmem:[#allocation5] sm:$0xf]  ;;  %v3683_v24 = vld [vmem:[#allocation5 + $0x10c] sm:$0xf0]  ;;  %v2900_v30 = vor.u32 %v3751_v19, %v2899_v17  ;;  %974 = vmatpush.bf16.msra.mxu1 %v2644_v22  ;;  %v3701_v60 = vld [vmem:[#allocation5 + $0x1a4] sm:$0xf]  ;;  %v2584_v1 = vor.u32 %v3669_v57, %v2581_v58 }
  0x34   :  { %v2627_v23 = vld [vmem:[#allocation5 + $0x100] sm:$0xf]  ;;  %v3715_v27 = vld [vmem:[#allocation5 + $0x20c] sm:$0xf0]  ;;  %v2500_v34 = vor.u32 %v3651_v21, %v2499_v20  ;;  %987 = vmatpush.bf16.msra.mxu2 %v2772_v26  ;;  %v2709_v61 = vld [vmem:[#allocation5 + $0x1b0] sm:$0xf0] }
  0x35   :  { %v2755_v25 = vld [vmem:[#allocation5 + $0x200] sm:$0xf]  ;;  %v3747_v35 = vld [vmem:[#allocation5 + $0x30c] sm:$0xf0]  ;;  %v2628_v38 = vor.u32 %v3683_v24, %v2627_v23  ;;  %1000 = vmatpush.bf16.msra.mxu3 %v2900_v30  ;;  %v3733_v63 = vld [vmem:[#allocation5 + $0x2a4] sm:$0xf]  ;;  %v2712_v4 = vor.u32 %v3701_v60, %v2709_v61 }
  0x36   :  { %v2883_v31 = vld [vmem:[#allocation5 + $0x300] sm:$0xf]  ;;  %v2756_v42 = vor.u32 %v3715_v27, %v2755_v25  ;;  %962 = vmatpush.bf16.msra.mxu0 %v2500_v34  ;;  %v2837_v0 = vld [vmem:[#allocation5 + $0x2b0] sm:$0xf0]  ;;  %v3765_v2 = vld [vmem:[#allocation5 + $0x3a4] sm:$0xf] }
  0x37   :  { %v2884_v46 = vor.u32 %v3747_v35, %v2883_v31  ;;  %975 = vmatpush.bf16.msra.mxu1 %v2628_v38  ;;  %v2965_v3 = vld [vmem:[#allocation5 + $0x3b0] sm:$0xf0]  ;;  %v2840_v5 = vor.u32 %v3733_v63, %v2837_v0  ;;  %v3665_v7 = vld [vmem:[#allocation5 + $0x84] sm:$0xf] }
  0x38   :  { %988 = vmatpush.bf16.msra.mxu2 %v2756_v42  ;;  %v2968_v6 = vor.u32 %v3765_v2, %v2965_v3  ;;  %v2565_v8 = vld [vmem:[#allocation5 + $0x90] sm:$0xf0]  ;;  %v3697_v9 = vld [vmem:[#allocation5 + $0x184] sm:$0xf]  ;;  %v108_v3 = vld [vmem:[%s4269_s1] sm:$0xff] }
  0x39   :  { %1001 = vmatpush.bf16.msra.mxu3 %v2884_v46  ;;  %v2568_v10 = vor.u32 %v3665_v7, %v2565_v8  ;;  %v2693_v11 = vld [vmem:[#allocation5 + $0x190] sm:$0xf0]  ;;  %v3729_v12 = vld [vmem:[#allocation5 + $0x284] sm:$0xf]  ;;  %v117_v7 = vperm.slane %v108_v3, 4  ;;  %v118_v8 = vperm.slane %v108_v3, 6 }
  0x3a   :  { %1007 = vmatpush.bf16.msrb.mxu0 %v2616_v39  ;;  %v2821_v13 = vld [vmem:[#allocation5 + $0x290] sm:$0xf0]  ;;  %v2696_v14 = vor.u32 %v3697_v9, %v2693_v11  ;;  %v3761_v16 = vld [vmem:[#allocation5 + $0x384] sm:$0xf]  ;;  %v135_v9 = vperm.slane %v108_v3, 1  ;;  %v137_v11 = vperm.slane %v108_v3, 5 }
  0x3b   :  { %1020 = vmatpush.bf16.msrb.mxu1 %v2744_v43  ;;  %v2824_v15 = vor.u32 %v3729_v12, %v2821_v13  ;;  %v2949_v17 = vld [vmem:[#allocation5 + $0x390] sm:$0xf0]  ;;  %v3661_v18 = vld [vmem:[#allocation5 + $0x64] sm:$0xf]  ;;  %v138_v12 = vperm.slane %v108_v3, 7 }
  0x3c   :  { %1033 = vmatpush.bf16.msrb.mxu2 %v2872_v47  ;;  %v2952_v19 = vor.u32 %v3761_v16, %v2949_v17  ;;  %v2549_v20 = vld [vmem:[#allocation5 + $0x70] sm:$0xf0]  ;;  %v3693_v21 = vld [vmem:[#allocation5 + $0x164] sm:$0xf]  ;;  %v126_v16 = vperm.slane %v118_v8, 0 }
  0x3d   :  { %1046 = vmatpush.bf16.msrb.mxu3 %v3000_v50  ;;  %v2677_v22 = vld [vmem:[#allocation5 + $0x170] sm:$0xf0]  ;;  %v2552_v23 = vor.u32 %v3661_v18, %v2549_v20  ;;  %v3725_v25 = vld [vmem:[#allocation5 + $0x264] sm:$0xf]  ;;  %v155_v17 = vld [vmem:[#allocation2] sm:$0xf] }
  0x3e   :  { %1008 = vmatpush.bf16.msrb.mxu0 %v2600_v53  ;;  %v2680_v24 = vor.u32 %v3693_v21, %v2677_v22  ;;  %v2805_v26 = vld [vmem:[#allocation5 + $0x270] sm:$0xf0]  ;;  %v3757_v27 = vld [vmem:[#allocation5 + $0x364] sm:$0xf]  ;;  %v143_v18 = vperm.slane %v135_v9, 1  ;;  %v145_v20 = vperm.slane %v137_v11, 1 }
  0x3f   :  { %1021 = vmatpush.bf16.msrb.mxu1 %v2728_v56  ;;  %v2808_v28 = vor.u32 %v3725_v25, %v2805_v26  ;;  %v2933_v29 = vld [vmem:[#allocation5 + $0x370] sm:$0xf0]  ;;  %v3657_v31 = vld [vmem:[#allocation5 + $0x44] sm:$0xf]  ;;  %v146_v21 = vperm.slane %v138_v12, 1  ;;  %v157_v22 = vperm.slane %v155_v17, 0 }
  0x40   :  { %1034 = vmatpush.bf16.msrb.mxu2 %v2856_v59  ;;  %v2936_v30 = vor.u32 %v3757_v27, %v2933_v29  ;;  %v2533_v32 = vld [vmem:[#allocation5 + $0x50] sm:$0xf0]  ;;  %v3689_v33 = vld [vmem:[#allocation5 + $0x144] sm:$0xf]  ;;  %v160_v25 = vperm.slane %v155_v17, 3 }
  0x41   :  { %1047 = vmatpush.bf16.msrb.mxu3 %v2984_v62  ;;  %v2661_v34 = vld [vmem:[#allocation5 + $0x150] sm:$0xf0]  ;;  %v2536_v35 = vor.u32 %v3657_v31, %v2533_v32  ;;  %v3721_v37 = vld [vmem:[#allocation5 + $0x244] sm:$0xf]  ;;  %v2587_v9 = vld [vmem:[#allocation5 + $0xa8] sm:$0xf] }
  0x42   :  { %1009 = vmatpush.bf16.msrb.mxu0 %v2584_v1  ;;  %v2664_v36 = vor.u32 %v3689_v33, %v2661_v34  ;;  %v2789_v38 = vld [vmem:[#allocation5 + $0x250] sm:$0xf0]  ;;  %v3753_v39 = vld [vmem:[#allocation5 + $0x344] sm:$0xf] }
  0x43   :  { %1022 = vmatpush.bf16.msrb.mxu1 %v2712_v4  ;;  %v2792_v40 = vor.u32 %v3721_v37, %v2789_v38  ;;  %v2917_v41 = vld [vmem:[#allocation5 + $0x350] sm:$0xf0]  ;;  %v3653_v43 = vld [vmem:[#allocation5 + $0x24] sm:$0xf] }
  0x44   :  { %1035 = vmatpush.bf16.msrb.mxu2 %v2840_v5  ;;  %v2920_v42 = vor.u32 %v3753_v39, %v2917_v41  ;;  %v2517_v44 = vld [vmem:[#allocation5 + $0x30] sm:$0xf0]  ;;  %v3685_v45 = vld [vmem:[#allocation5 + $0x124] sm:$0xf]  ;;  %v115_v5 = vperm.slane %v108_v3, 0 }
  0x45   :  { %1048 = vmatpush.bf16.msrb.mxu3 %v2968_v6  ;;  %v2520_v46 = vor.u32 %v3653_v43, %v2517_v44  ;;  %v2645_v47 = vld [vmem:[#allocation5 + $0x130] sm:$0xf0]  ;;  %v3717_v48 = vld [vmem:[#allocation5 + $0x224] sm:$0xf]  ;;  %v116_v6 = vperm.slane %v108_v3, 2 }
  0x46   :  { %1010 = vmatpush.bf16.msrb.mxu0 %v2568_v10  ;;  %v2773_v49 = vld [vmem:[#allocation5 + $0x230] sm:$0xf0]  ;;  %v2648_v50 = vor.u32 %v3685_v45, %v2645_v47  ;;  %v3749_v52 = vld [vmem:[#allocation5 + $0x324] sm:$0xf]  ;;  %v136_v10 = vperm.slane %v108_v3, 3  ;;  %v123_v13 = vperm.slane %v115_v5, 0 }
  0x47   :  { %1023 = vmatpush.bf16.msrb.mxu1 %v2696_v14  ;;  %v2776_v51 = vor.u32 %v3717_v48, %v2773_v49  ;;  %v2901_v53 = vld [vmem:[#allocation5 + $0x330] sm:$0xf0]  ;;  %v3649_v54 = vld [vmem:[#allocation5 + $0x4] sm:$0xf]  ;;  %v124_v14 = vperm.slane %v116_v6, 0 }
  0x48   :  { %1036 = vmatpush.bf16.msrb.mxu2 %v2824_v15  ;;  %v2904_v55 = vor.u32 %v3749_v52, %v2901_v53  ;;  %v2501_v56 = vld [vmem:[#allocation5 + $0x10] sm:$0xf0]  ;;  %v3681_v57 = vld [vmem:[#allocation5 + $0x104] sm:$0xf]  ;;  %v125_v15 = vperm.slane %v117_v7, 0 }
  0x49   :  { %1049 = vmatpush.bf16.msrb.mxu3 %v2952_v19  ;;  %v2629_v58 = vld [vmem:[#allocation5 + $0x110] sm:$0xf0]  ;;  %v2504_v59 = vor.u32 %v3649_v54, %v2501_v56  ;;  %v3713_v61 = vld [vmem:[#allocation5 + $0x204] sm:$0xf]  ;;  %v144_v19 = vperm.slane %v136_v10, 1 }
  0x4a   :  { %1011 = vmatpush.bf16.msrb.mxu0 %v2552_v23  ;;  %v2632_v60 = vor.u32 %v3681_v57, %v2629_v58  ;;  %v2757_v62 = vld [vmem:[#allocation5 + $0x210] sm:$0xf0]  ;;  %v3745_v63 = vld [vmem:[#allocation5 + $0x304] sm:$0xf]  ;;  %v158_v23 = vperm.slane %v155_v17, 1 }
  0x4b   :  { %1024 = vmatpush.bf16.msrb.mxu1 %v2680_v24  ;;  %v2760_v0 = vor.u32 %v3713_v61, %v2757_v62  ;;  %v2885_v1 = vld [vmem:[#allocation5 + $0x310] sm:$0xf0]  ;;  %v159_v24 = vperm.slane %v155_v17, 2  ;;  %v2619_v39 = vld [vmem:[#allocation5 + $0xe8] sm:$0xf] }
  0x4c   :  { %1037 = vmatpush.bf16.msrb.mxu2 %v2808_v28  ;;  %v2888_v2 = vor.u32 %v3745_v63, %v2885_v1  ;;  %v3680_v44 = vld [vmem:[#allocation5 + $0xf4] sm:$0xf0]  ;;  %v2747_v45 = vld [vmem:[#allocation5 + $0x1e8] sm:$0xf] }
  0x4d   :  { %1050 = vmatpush.bf16.msrb.mxu3 %v2936_v30  ;;  %v2875_v47 = vld [vmem:[#allocation5 + $0x2e8] sm:$0xf]  ;;  %v3744_v48 = vld [vmem:[#allocation5 + $0x2f4] sm:$0xf0] }
  0x4e   :  { %1012 = vmatpush.bf16.msrb.mxu0 %v2536_v35  ;;  %v3003_v49 = vld [vmem:[#allocation5 + $0x3e8] sm:$0xf]  ;;  %v3776_v54 = vld [vmem:[#allocation5 + $0x3f4] sm:$0xf0]  ;;  %v2876_v63 = vor.u32 %v3744_v48, %v2875_v47 }
  0x4f   :  { %1025 = vmatpush.bf16.msrb.mxu1 %v2664_v36  ;;  %v2603_v61 = vld [vmem:[#allocation5 + $0xc8] sm:$0xf]  ;;  %v3676_v62 = vld [vmem:[#allocation5 + $0xd4] sm:$0xf0] }
  0x50   :  { %1038 = vmatpush.bf16.msrb.mxu2 %v2792_v40  ;;  %v2731_v1 = vld [vmem:[#allocation5 + $0x1c8] sm:$0xf]  ;;  %v3772_v6 = vld [vmem:[#allocation5 + $0x3d4] sm:$0xf0]  ;;  %v2604_v7 = vor.u32 %v3676_v62, %v2603_v61 }
  0x51   :  { %1051 = vmatpush.bf16.msrb.mxu3 %v2920_v42  ;;  %v2859_v3 = vld [vmem:[#allocation5 + $0x2c8] sm:$0xf]  ;;  %v3672_v10 = vld [vmem:[#allocation5 + $0xb4] sm:$0xf0] }
  0x52   :  { %1013 = vmatpush.bf16.msrb.mxu0 %v2520_v46  ;;  %v3712_v46 = vld [vmem:[#allocation5 + $0x1f4] sm:$0xf0]  ;;  %v2987_v5 = vld [vmem:[#allocation5 + $0x3c8] sm:$0xf] }
  0x53   :  { %1026 = vmatpush.bf16.msrb.mxu1 %v2648_v50  ;;  %v2748_v56 = vor.u32 %v3712_v46, %v2747_v45  ;;  %v2988_v12 = vor.u32 %v3772_v6, %v2987_v5  ;;  %v2971_v17 = vld [vmem:[#allocation5 + $0x3a8] sm:$0xf]  ;;  %v3660_v46 = vld [vmem:[#allocation5 + $0x54] sm:$0xf0] }
  0x54   :  { %1039 = vmatpush.bf16.msrb.mxu2 %v2776_v51  ;;  %v2539_v45 = vld [vmem:[#allocation5 + $0x48] sm:$0xf]  ;;  %v3656_v62 = vld [vmem:[#allocation5 + $0x34] sm:$0xf0] }
  0x55   :  { %1052 = vmatpush.bf16.msrb.mxu3 %v2904_v55  ;;  %v2620_v55 = vor.u32 %v3680_v44, %v2619_v39  ;;  %v2811_v39 = vld [vmem:[#allocation5 + $0x268] sm:$0xf]  ;;  %v3752_v6 = vld [vmem:[#allocation5 + $0x334] sm:$0xf0] }
  0x56   :  { %1014 = vmatpush.bf16.msrb.mxu0 %v2504_v59  ;;  %v2523_v61 = vld [vmem:[#allocation5 + $0x28] sm:$0xf] }
  0x57   :  { %1027 = vmatpush.bf16.msrb.mxu1 %v2632_v60  ;;  %v2907_v5 = vld [vmem:[#allocation5 + $0x328] sm:$0xf] }
  0x58   :  { %1040 = vmatpush.bf16.msrb.mxu2 %v2760_v0  ;;  %v3004_v0 = vor.u32 %v3776_v54, %v3003_v49  ;;  %v2667_v49 = vld [vmem:[#allocation5 + $0x148] sm:$0xf]  ;;  %v3756_v54 = vld [vmem:[#allocation5 + $0x354] sm:$0xf0] }
  0x59   :  { %1053 = vmatpush.bf16.msrb.mxu3 %v2888_v2  ;;  %v3708_v2 = vld [vmem:[#allocation5 + $0x1d4] sm:$0xf0] }
  0x5a   :  { %v2732_v8 = vor.u32 %v3708_v2, %v2731_v1  ;;  %v2651_v1 = vld [vmem:[#allocation5 + $0x128] sm:$0xf]  ;;  %v3688_v2 = vld [vmem:[#allocation5 + $0x134] sm:$0xf0] }
  0x8a   :  { %v112_v4 = vpop.permute.xlu0 %111 }
  0x8b   :  { %v127_v26 = vmul.f32 %v123_v13, %v112_v4  ;;  %v128_v27 = vmul.f32 %v124_v14, %v112_v4  ;;  %v129_v28 = vmul.f32 %v125_v15, %v112_v4  ;;  %v130_v29 = vmul.f32 %v126_v16, %v112_v4  ;;  %v3740_v4 = vld [vmem:[#allocation5 + $0x2d4] sm:$0xf0]  ;;  %v2715_v13 = vld [vmem:[#allocation5 + $0x1a8] sm:$0xf] }
  0x8c   :  { %v2860_v11 = vor.u32 %v3740_v4, %v2859_v3  ;;  %v3704_v14 = vld [vmem:[#allocation5 + $0x1b4] sm:$0xf0]  ;;  %v2843_v15 = vld [vmem:[#allocation5 + $0x2a8] sm:$0xf] }
  0x8d   :  { %v3736_v16 = vld [vmem:[#allocation5 + $0x2b4] sm:$0xf0]  ;;  %v2779_v3 = vld [vmem:[#allocation5 + $0x228] sm:$0xf] }
  0x8e   :  { %v3720_v4 = vld [vmem:[#allocation5 + $0x234] sm:$0xf0] }
  0x93   :  { %v133_v30 = vpop.permute.xlu0 %132 }
  0x94   :  { %v147_v31 = vmul.f32 %v143_v18, %v133_v30  ;;  %v148_v32 = vmul.f32 %v144_v19, %v133_v30  ;;  %v149_v33 = vmul.f32 %v145_v20, %v133_v30  ;;  %v150_v34 = vmul.f32 %v146_v21, %v133_v30  ;;  %v3768_v18 = vld [vmem:[#allocation5 + $0x3b4] sm:$0xf0]  ;;  %v2571_v21 = vld [vmem:[#allocation5 + $0x88] sm:$0xf] }
  0x95   :  { %v2588_v19 = vor.u32 %v3672_v10, %v2587_v9  ;;  %v2716_v20 = vor.u32 %v3704_v14, %v2715_v13  ;;  %v3764_v30 = vld [vmem:[#allocation5 + $0x394] sm:$0xf0]  ;;  %v2652_v9 = vor.u32 %v3688_v2, %v2651_v1  ;;  %v2780_v13 = vor.u32 %v3720_v4, %v2779_v3  ;;  %v3698_v1 = vld [vmem:[#allocation5 + $0x18c] sm:$0xf]  ;;  %v2701_v2 = vld [vmem:[#allocation5 + $0x198] sm:$0xf0] }
  0x96   :  { %v151_v35 = vadd.f32 %v147_v31, %v127_v26  ;;  %v152_v36 = vadd.f32 %v148_v32, %v128_v27  ;;  %v153_v37 = vadd.f32 %v149_v33, %v129_v28  ;;  %v154_v38 = vadd.f32 %v150_v34, %v130_v29  ;;  %v3700_v26 = vld [vmem:[#allocation5 + $0x194] sm:$0xf0]  ;;  %v2827_v27 = vld [vmem:[#allocation5 + $0x288] sm:$0xf]  ;;  %v3730_v3 = vld [vmem:[#allocation5 + $0x28c] sm:$0xf] }
  0x97   :  { %v3732_v28 = vld [vmem:[#allocation5 + $0x294] sm:$0xf0]  ;;  %v2955_v29 = vld [vmem:[#allocation5 + $0x388] sm:$0xf]  ;;  %v2908_v14 = vor.u32 %v3752_v6, %v2907_v5  ;;  %v2829_v4 = vld [vmem:[#allocation5 + $0x298] sm:$0xf0] }
  0x98   :  { %v165_v40 = vadd.f32 %v157_v22, %v151_v35  ;;  %v166_v41 = vadd.f32 %v158_v23, %v152_v36  ;;  %v167_v42 = vadd.f32 %v159_v24, %v153_v37  ;;  %v168_v43 = vadd.f32 %v160_v25, %v154_v38  ;;  %v3668_v22 = vld [vmem:[#allocation5 + $0x94] sm:$0xf0]  ;;  %v2699_v25 = vld [vmem:[#allocation5 + $0x188] sm:$0xf]  ;;  %v3762_v5 = vld [vmem:[#allocation5 + $0x38c] sm:$0xf] }
  0x99   :  { %v2844_v23 = vor.u32 %v3736_v16, %v2843_v15  ;;  %v2972_v24 = vor.u32 %v3768_v18, %v2971_v17  ;;  %v2572_v31 = vor.u32 %v3668_v22, %v2571_v21  ;;  %v2700_v32 = vor.u32 %v3700_v26, %v2699_v25  ;;  %v2555_v33 = vld [vmem:[#allocation5 + $0x68] sm:$0xf]  ;;  %v3664_v34 = vld [vmem:[#allocation5 + $0x74] sm:$0xf0]  ;;  %v3710_v21 = vld [vmem:[#allocation5 + $0x1ec] sm:$0xf] }
  0x9a   :  { %v169_v50 = vmax.f32 %v165_v40, 0.0  ;;  %v170_v51 = vmax.f32 %v166_v41, 0.0  ;;  %v171_v52 = vmax.f32 %v167_v42, 0.0  ;;  %v172_v53 = vmax.f32 %v168_v43, 0.0  ;;  %v2683_v37 = vld [vmem:[#allocation5 + $0x168] sm:$0xf] }
  0x9b   :  { %v2828_v35 = vor.u32 %v3732_v28, %v2827_v27  ;;  %v2956_v36 = vor.u32 %v3764_v30, %v2955_v29  ;;  %v3696_v38 = vld [vmem:[#allocation5 + $0x174] sm:$0xf0]  ;;  %v2939_v41 = vld [vmem:[#allocation5 + $0x368] sm:$0xf]  ;;  %v2556_v43 = vor.u32 %v3664_v34, %v2555_v33  ;;  %v2749_v22 = vld [vmem:[#allocation5 + $0x1f8] sm:$0xf0] }
  0x9c   :  { %v4187_v57 = vpack.c.bf16 %v169_v50, %v169_v50  ;;  %v4189_v58 = vpack.c.bf16 %v170_v51, %v170_v51  ;;  %v4191_v59 = vpack.c.bf16 %v171_v52, %v171_v52  ;;  %v4193_v60 = vpack.c.bf16 %v172_v53, %v172_v53  ;;  %v3728_v40 = vld [vmem:[#allocation5 + $0x274] sm:$0xf0]  ;;  %v2795_v51 = vld [vmem:[#allocation5 + $0x248] sm:$0xf]  ;;  %v2877_v26 = vld [vmem:[#allocation5 + $0x2f8] sm:$0xf0] }
  0x9d   :  { %v3760_v42 = vld [vmem:[#allocation5 + $0x374] sm:$0xf0]  ;;  %v2684_v44 = vor.u32 %v3696_v38, %v2683_v37  ;;  %v2812_v47 = vor.u32 %v3728_v40, %v2811_v39  ;;  %v2923_v53 = vld [vmem:[#allocation5 + $0x348] sm:$0xf]  ;;  %v3774_v27 = vld [vmem:[#allocation5 + $0x3ec] sm:$0xf] }
  0x9e   :  { %963 = vmatmul.bf16.vlgmr.msra.gmra.mxu0 %v4187_v57  ;;  %976 = vmatmul.bf16.vlgmr.msra.gmra.mxu1 %v4189_v58  ;;  %v2940_v48 = vor.u32 %v3760_v42, %v2939_v41  ;;  %v3692_v50 = vld [vmem:[#allocation5 + $0x154] sm:$0xf0]  ;;  %v2763_v15 = vld [vmem:[#allocation5 + $0x208] sm:$0xf]  ;;  %v3005_v28 = vld [vmem:[#allocation5 + $0x3f8] sm:$0xf0] }
  0x9f   :  { %989 = vmatmul.bf16.vlgmr.msra.gmra.mxu2 %v4191_v59  ;;  %1002 = vmatmul.bf16.vlgmr.msra.gmra.mxu3 %v4193_v60  ;;  %v3724_v52 = vld [vmem:[#allocation5 + $0x254] sm:$0xf0]  ;;  %v2891_v17 = vld [vmem:[#allocation5 + $0x308] sm:$0xf]  ;;  %v3674_v33 = vld [vmem:[#allocation5 + $0xcc] sm:$0xf] }
  0xa0   :  { %1059 = vmatpush.bf16.msra.mxu0 %v2620_v55  ;;  %1072 = vmatpush.bf16.msra.mxu1 %v2748_v56  ;;  %v2540_v55 = vor.u32 %v3660_v46, %v2539_v45  ;;  %v2668_v56 = vor.u32 %v3692_v50, %v2667_v49  ;;  %v3652_v10 = vld [vmem:[#allocation5 + $0x14] sm:$0xf0]  ;;  %v2605_v34 = vld [vmem:[#allocation5 + $0xd8] sm:$0xf0]  ;;  %v3706_v37 = vld [vmem:[#allocation5 + $0x1cc] sm:$0xf] }
  0xa1   :  { %1085 = vmatpush.bf16.msra.mxu2 %v2876_v63  ;;  %1098 = vmatpush.bf16.msra.mxu3 %v3004_v0  ;;  %v2796_v63 = vor.u32 %v3724_v52, %v2795_v51  ;;  %v2924_v0 = vor.u32 %v3756_v54, %v2923_v53  ;;  %v3716_v16 = vld [vmem:[#allocation5 + $0x214] sm:$0xf0]  ;;  %v2733_v38 = vld [vmem:[#allocation5 + $0x1d8] sm:$0xf0]  ;;  %v3738_v39 = vld [vmem:[#allocation5 + $0x2cc] sm:$0xf] }
  0xa2   :  { %v3748_v18 = vld [vmem:[#allocation5 + $0x314] sm:$0xf0]  ;;  %v2764_v29 = vor.u32 %v3716_v16, %v2763_v15  ;;  %v2861_v40 = vld [vmem:[#allocation5 + $0x2d8] sm:$0xf0]  ;;  %v3770_v41 = vld [vmem:[#allocation5 + $0x3cc] sm:$0xf] }
  0xa3   :  { %v2892_v30 = vor.u32 %v3748_v18, %v2891_v17  ;;  %v2989_v42 = vld [vmem:[#allocation5 + $0x3d8] sm:$0xf0]  ;;  %v3670_v45 = vld [vmem:[#allocation5 + $0xac] sm:$0xf] }
  0xa4   :  { %1060 = vmatpush.bf16.msra.mxu0 %v2604_v7  ;;  %1073 = vmatpush.bf16.msra.mxu1 %v2732_v8  ;;  %v2507_v7 = vld [vmem:[#allocation5 + $0x8] sm:$0xf]  ;;  %v2524_v8 = vor.u32 %v3656_v62, %v2523_v61  ;;  %v2589_v46 = vld [vmem:[#allocation5 + $0xb8] sm:$0xf0]  ;;  %v3702_v49 = vld [vmem:[#allocation5 + $0x1ac] sm:$0xf] }
  0xa5   :  { %1086 = vmatpush.bf16.msra.mxu2 %v2860_v11  ;;  %1099 = vmatpush.bf16.msra.mxu3 %v2988_v12  ;;  %v2635_v11 = vld [vmem:[#allocation5 + $0x108] sm:$0xf]  ;;  %v3684_v12 = vld [vmem:[#allocation5 + $0x114] sm:$0xf0]  ;;  %v2717_v50 = vld [vmem:[#allocation5 + $0x1b8] sm:$0xf0] }
  0xa6   :  { %v2636_v25 = vor.u32 %v3684_v12, %v2635_v11  ;;  %v3734_v51 = vld [vmem:[#allocation5 + $0x2ac] sm:$0xf]  ;;  %v2845_v52 = vld [vmem:[#allocation5 + $0x2b8] sm:$0xf0]  ;;  %v2832_v11 = vor.u32 %v3730_v3, %v2829_v4  ;;  %v3107_v4 = vld [vmem:[#allocation7 + $0xc0] sm:$0xf] }
  0xa7   :  { %v3766_v53 = vld [vmem:[#allocation5 + $0x3ac] sm:$0xf]  ;;  %v2973_v54 = vld [vmem:[#allocation5 + $0x3b8] sm:$0xf0] }
  0xa8   :  { %1061 = vmatpush.bf16.msra.mxu0 %v2588_v19  ;;  %1074 = vmatpush.bf16.msra.mxu1 %v2716_v20  ;;  %v3678_v19 = vld [vmem:[#allocation5 + $0xec] sm:$0xf]  ;;  %v2621_v20 = vld [vmem:[#allocation5 + $0xf8] sm:$0xf0] }
  0xa9   :  { %1087 = vmatpush.bf16.msra.mxu2 %v2844_v23  ;;  %1100 = vmatpush.bf16.msra.mxu3 %v2972_v24  ;;  %v3742_v23 = vld [vmem:[#allocation5 + $0x2ec] sm:$0xf]  ;;  %v2508_v24 = vor.u32 %v3652_v10, %v2507_v7  ;;  %v2573_v62 = vld [vmem:[#allocation5 + $0x98] sm:$0xf0] }
  0xaa   :  { %v3666_v61 = vld [vmem:[#allocation5 + $0x8c] sm:$0xf]  ;;  %v2957_v6 = vld [vmem:[#allocation5 + $0x398] sm:$0xf0] }
  0xab   :  { %v2576_v7 = vor.u32 %v3666_v61, %v2573_v62  ;;  %v2557_v10 = vld [vmem:[#allocation5 + $0x78] sm:$0xf0]  ;;  %v2960_v12 = vor.u32 %v3762_v5, %v2957_v6  ;;  %v3726_v15 = vld [vmem:[#allocation5 + $0x26c] sm:$0xf]  ;;  %v3251_v61 = vld [vmem:[#allocation7 + $0x1e0] sm:$0xf] }
  0xac   :  { %1062 = vmatpush.bf16.msra.mxu0 %v2572_v31  ;;  %1075 = vmatpush.bf16.msra.mxu1 %v2700_v32  ;;  %v2624_v31 = vor.u32 %v3678_v19, %v2621_v20  ;;  %v2752_v32 = vor.u32 %v3710_v21, %v2749_v22  ;;  %v2813_v16 = vld [vmem:[#allocation5 + $0x278] sm:$0xf0]  ;;  %v3758_v17 = vld [vmem:[#allocation5 + $0x36c] sm:$0xf]  ;;  %v3839_v62 = vld [vmem:[#allocation7 + $0x1ec] sm:$0xf0] }
  0xad   :  { %1088 = vmatpush.bf16.msra.mxu2 %v2828_v35  ;;  %1101 = vmatpush.bf16.msra.mxu3 %v2956_v36  ;;  %v2880_v35 = vor.u32 %v3742_v23, %v2877_v26  ;;  %v3008_v36 = vor.u32 %v3774_v27, %v3005_v28  ;;  %v2941_v18 = vld [vmem:[#allocation5 + $0x378] sm:$0xf0]  ;;  %v3658_v21 = vld [vmem:[#allocation5 + $0x4c] sm:$0xf]  ;;  %v2816_v23 = vor.u32 %v3726_v15, %v2813_v16  ;;  %v3803_v6 = vld [vmem:[#allocation7 + $0xcc] sm:$0xf0] }
  0xae   :  { %1015 = vmatmul.bf16.vlgmr.msrb.gmra.mxu0 %v4187_v57  ;;  %1028 = vmatmul.bf16.vlgmr.msrb.gmra.mxu1 %v4189_v58  ;;  %v2541_v22 = vld [vmem:[#allocation5 + $0x58] sm:$0xf0]  ;;  %v3722_v27 = vld [vmem:[#allocation5 + $0x24c] sm:$0xf]  ;;  %v3252_v5 = vor.u32 %v3839_v62, %v3251_v61  ;;  %v3219_v16 = vld [vmem:[#allocation7 + $0x1a0] sm:$0xf] }
  0xaf   :  { %1041 = vmatmul.bf16.vlgmr.msrb.gmra.mxu2 %v4191_v59  ;;  %1054 = vmatmul.bf16.vlgmr.msrb.gmra.mxu3 %v4193_v60  ;;  %v2669_v26 = vld [vmem:[#allocation5 + $0x158] sm:$0xf0]  ;;  %v3139_v62 = vld [vmem:[#allocation7 + $0x100] sm:$0xf] }
  0xb0   :  { %1063 = vmatpush.bf16.msra.mxu0 %v2556_v43  ;;  %1076 = vmatpush.bf16.msra.mxu1 %v2684_v44  ;;  %v2608_v43 = vor.u32 %v3674_v33, %v2605_v34  ;;  %v2736_v44 = vor.u32 %v3706_v37, %v2733_v38  ;;  %v2797_v28 = vld [vmem:[#allocation5 + $0x258] sm:$0xf0]  ;;  %v3654_v33 = vld [vmem:[#allocation5 + $0x2c] sm:$0xf] }
  0xb1   :  { %1089 = vmatpush.bf16.msra.mxu2 %v2812_v47  ;;  %1102 = vmatpush.bf16.msra.mxu3 %v2940_v48  ;;  %v2864_v47 = vor.u32 %v3738_v39, %v2861_v40  ;;  %v2992_v48 = vor.u32 %v3770_v41, %v2989_v42  ;;  %v2525_v34 = vld [vmem:[#allocation5 + $0x38] sm:$0xf0]  ;;  %v3686_v37 = vld [vmem:[#allocation5 + $0x12c] sm:$0xf] }
  0xb2   :  { %v2653_v38 = vld [vmem:[#allocation5 + $0x138] sm:$0xf0]  ;;  %v3718_v39 = vld [vmem:[#allocation5 + $0x22c] sm:$0xf] }
  0xb3   :  { %v2781_v40 = vld [vmem:[#allocation5 + $0x238] sm:$0xf0]  ;;  %v3750_v41 = vld [vmem:[#allocation5 + $0x32c] sm:$0xf] }
  0xb4   :  { %1064 = vmatpush.bf16.msra.mxu0 %v2540_v55  ;;  %1077 = vmatpush.bf16.msra.mxu1 %v2668_v56  ;;  %v2592_v55 = vor.u32 %v3670_v45, %v2589_v46  ;;  %v2720_v56 = vor.u32 %v3702_v49, %v2717_v50  ;;  %v2909_v42 = vld [vmem:[#allocation5 + $0x338] sm:$0xf0]  ;;  %v3650_v45 = vld [vmem:[#allocation5 + $0xc] sm:$0xf] }
  0xb5   :  { %1090 = vmatpush.bf16.msra.mxu2 %v2796_v63  ;;  %1103 = vmatpush.bf16.msra.mxu3 %v2924_v0  ;;  %v2848_v63 = vor.u32 %v3734_v51, %v2845_v52  ;;  %v2976_v0 = vor.u32 %v3766_v53, %v2973_v54  ;;  %v2509_v46 = vld [vmem:[#allocation5 + $0x18] sm:$0xf0]  ;;  %v2912_v49 = vor.u32 %v3750_v41, %v2909_v42  ;;  %v3714_v51 = vld [vmem:[#allocation5 + $0x20c] sm:$0xf]  ;;  %v3783_v41 = vld [vmem:[#allocation7 + $0x2c] sm:$0xf0] }
  0xb6   :  { %v2637_v50 = vld [vmem:[#allocation5 + $0x118] sm:$0xf0]  ;;  %v3746_v53 = vld [vmem:[#allocation5 + $0x30c] sm:$0xf]  ;;  %v3155_v42 = vld [vmem:[#allocation7 + $0x120] sm:$0xf] }
  0xb7   :  { %v2765_v52 = vld [vmem:[#allocation5 + $0x218] sm:$0xf0] }
  0xb8   :  { %1065 = vmatpush.bf16.msra.mxu0 %v2524_v8  ;;  %1078 = vmatpush.bf16.msra.mxu1 %v2652_v9  ;;  %v2704_v8 = vor.u32 %v3698_v1, %v2701_v2  ;;  %v3662_v9 = vld [vmem:[#allocation5 + $0x6c] sm:$0xf]  ;;  %v2893_v54 = vld [vmem:[#allocation5 + $0x318] sm:$0xf0]  ;;  %v2768_v1 = vor.u32 %v3714_v51, %v2765_v52  ;;  %v3801_v52 = vld [vmem:[#allocation7 + $0xc4] sm:$0xf] }
  0xb9   :  { %1091 = vmatpush.bf16.msra.mxu2 %v2780_v13  ;;  %1104 = vmatpush.bf16.msra.mxu3 %v2908_v14  ;;  %v3694_v13 = vld [vmem:[#allocation5 + $0x16c] sm:$0xf]  ;;  %v2685_v14 = vld [vmem:[#allocation5 + $0x178] sm:$0xf0]  ;;  %v2560_v19 = vor.u32 %v3662_v9, %v2557_v10  ;;  %v2896_v2 = vor.u32 %v3746_v53, %v2893_v54  ;;  %v3379_v9 = vld [vmem:[#allocation7 + $0x2e0] sm:$0xf] }
  0xba   :  { %v2688_v20 = vor.u32 %v3694_v13, %v2685_v14  ;;  %v3871_v10 = vld [vmem:[#allocation7 + $0x2ec] sm:$0xf0]  ;;  %v3091_v13 = vld [vmem:[#allocation7 + $0xa0] sm:$0xf]  ;;  %v3109_v53 = vld [vmem:[#allocation7 + $0xd0] sm:$0xf0] }
  0xbb   :  { %v3799_v14 = vld [vmem:[#allocation7 + $0xac] sm:$0xf0]  ;;  %v3112_v54 = vor.u32 %v3801_v52, %v3109_v53  ;;  %v3173_v52 = vld [vmem:[#allocation7 + $0x150] sm:$0xf0]  ;;  %v3865_v53 = vld [vmem:[#allocation7 + $0x2c4] sm:$0xf] }
  0xbc   :  { %1066 = vmatpush.bf16.msra.mxu0 %v2508_v24  ;;  %1079 = vmatpush.bf16.msra.mxu1 %v2636_v25  ;;  %v2944_v24 = vor.u32 %v3758_v17, %v2941_v18  ;;  %v3690_v25 = vld [vmem:[#allocation5 + $0x14c] sm:$0xf]  ;;  %v3831_v17 = vld [vmem:[#allocation7 + $0x1ac] sm:$0xf0]  ;;  %v3363_v18 = vld [vmem:[#allocation7 + $0x2c0] sm:$0xf] }
  0xbd   :  { %1092 = vmatpush.bf16.msra.mxu2 %v2764_v29  ;;  %1105 = vmatpush.bf16.msra.mxu3 %v2892_v30  ;;  %v3754_v29 = vld [vmem:[#allocation5 + $0x34c] sm:$0xf]  ;;  %v2925_v30 = vld [vmem:[#allocation5 + $0x358] sm:$0xf0] }
  0xbf   :  { %1067 = vmatmul.bf16.vlgmr.msra.gmra.mxu0 %v4187_v57  ;;  %1080 = vmatmul.bf16.vlgmr.msra.gmra.mxu1 %v4189_v58 }
  0xc0   :  { %1111 = vmatpush.bf16.msrb.mxu0 %v2624_v31  ;;  %1124 = vmatpush.bf16.msrb.mxu1 %v2752_v32  ;;  %v2544_v31 = vor.u32 %v3658_v21, %v2541_v22  ;;  %v2672_v32 = vor.u32 %v3690_v25, %v2669_v26  ;;  %v3092_v21 = vor.u32 %v3799_v14, %v3091_v13  ;;  %v3075_v22 = vld [vmem:[#allocation7 + $0x80] sm:$0xf]  ;;  %v3789_v13 = vld [vmem:[#allocation7 + $0x64] sm:$0xf]  ;;  %v3061_v14 = vld [vmem:[#allocation7 + $0x70] sm:$0xf0] }
  0xc1   :  { %1137 = vmatpush.bf16.msrb.mxu2 %v2880_v35  ;;  %1150 = vmatpush.bf16.msrb.mxu3 %v3008_v36  ;;  %v2800_v35 = vor.u32 %v3722_v27, %v2797_v28  ;;  %v2928_v36 = vor.u32 %v3754_v29, %v2925_v30  ;;  %v3203_v25 = vld [vmem:[#allocation7 + $0x180] sm:$0xf]  ;;  %v3791_v29 = vld [vmem:[#allocation7 + $0x6c] sm:$0xf0] }
  0xc2   :  { %1093 = vmatmul.bf16.vlgmr.msra.gmra.mxu2 %v4191_v59  ;;  %1106 = vmatmul.bf16.vlgmr.msra.gmra.mxu3 %v4193_v60  ;;  %v3347_v26 = vld [vmem:[#allocation7 + $0x2a0] sm:$0xf] }
  0xc3   :  { %v3187_v30 = vld [vmem:[#allocation7 + $0x160] sm:$0xf] }
  0xc4   :  { %1112 = vmatpush.bf16.msrb.mxu0 %v2608_v43  ;;  %1125 = vmatpush.bf16.msrb.mxu1 %v2736_v44  ;;  %v2528_v43 = vor.u32 %v3654_v33, %v2525_v34  ;;  %v2656_v44 = vor.u32 %v3686_v37, %v2653_v38  ;;  %v3043_v33 = vld [vmem:[#allocation7 + $0x40] sm:$0xf]  ;;  %v3819_v37 = vld [vmem:[#allocation7 + $0x14c] sm:$0xf0] }
  0xc5   :  { %1138 = vmatpush.bf16.msrb.mxu2 %v2864_v47  ;;  %1151 = vmatpush.bf16.msrb.mxu3 %v2992_v48  ;;  %v3682_v47 = vld [vmem:[#allocation5 + $0x10c] sm:$0xf]  ;;  %v2784_v48 = vor.u32 %v3718_v39, %v2781_v40  ;;  %v3027_v39 = vld [vmem:[#allocation7 + $0x20] sm:$0xf] }
  0xc8   :  { %1113 = vmatpush.bf16.msrb.mxu0 %v2592_v55  ;;  %1126 = vmatpush.bf16.msrb.mxu1 %v2720_v56  ;;  %v3123_v55 = vld [vmem:[#allocation7 + $0xe0] sm:$0xf]  ;;  %v3807_v56 = vld [vmem:[#allocation7 + $0xec] sm:$0xf0] }
  0xc9   :  { %1139 = vmatpush.bf16.msrb.mxu2 %v2848_v63  ;;  %1152 = vmatpush.bf16.msrb.mxu3 %v2976_v0  ;;  %v2512_v63 = vor.u32 %v3650_v45, %v2509_v46  ;;  %v2640_v0 = vor.u32 %v3682_v47, %v2637_v50  ;;  %v3124_v3 = vor.u32 %v3807_v56, %v3123_v55  ;;  %v3011_v46 = vld [vmem:[#allocation7] sm:$0xf]  ;;  %v3779_v47 = vld [vmem:[#allocation7 + $0xc] sm:$0xf0]  ;;  %v3797_v55 = vld [vmem:[#allocation7 + $0xa4] sm:$0xf] }
  0xca   :  { %v3012_v50 = vor.u32 %v3779_v47, %v3011_v46  ;;  %v3093_v56 = vld [vmem:[#allocation7 + $0xb0] sm:$0xf0]  ;;  %v3491_v47 = vld [vmem:[#allocation7 + $0x3c0] sm:$0xf] }
  0xcb   :  { %v3096_v61 = vor.u32 %v3797_v55, %v3093_v56  ;;  %v3365_v55 = vld [vmem:[#allocation7 + $0x2d0] sm:$0xf0] }
  0xcc   :  { %1114 = vmatpush.bf16.msrb.mxu0 %v2576_v7  ;;  %1127 = vmatpush.bf16.msrb.mxu1 %v2704_v8  ;;  %v3235_v7 = vld [vmem:[#allocation7 + $0x1c0] sm:$0xf]  ;;  %v3835_v8 = vld [vmem:[#allocation7 + $0x1cc] sm:$0xf0]  ;;  %v3368_v56 = vor.u32 %v3865_v53, %v3365_v55  ;;  %v3269_v55 = vld [vmem:[#allocation7 + $0x210] sm:$0xf0] }
  0xcd   :  { %1140 = vmatpush.bf16.msrb.mxu2 %v2832_v11  ;;  %1153 = vmatpush.bf16.msrb.mxu3 %v2960_v12  ;;  %v3380_v11 = vor.u32 %v3871_v10, %v3379_v9  ;;  %v3108_v12 = vor.u32 %v3803_v6, %v3107_v4  ;;  %v3236_v15 = vor.u32 %v3835_v8, %v3235_v7  ;;  %v3859_v4 = vld [vmem:[#allocation7 + $0x28c] sm:$0xf0]  ;;  %v3837_v6 = vld [vmem:[#allocation7 + $0x1e4] sm:$0xf]  ;;  %v3253_v7 = vld [vmem:[#allocation7 + $0x1f0] sm:$0xf0] }
  0xce   :  { %v3315_v8 = vld [vmem:[#allocation7 + $0x260] sm:$0xf]  ;;  %v3256_v9 = vor.u32 %v3837_v6, %v3253_v7  ;;  %v3855_v10 = vld [vmem:[#allocation7 + $0x26c] sm:$0xf0] }
  0xd0   :  { %1115 = vmatpush.bf16.msrb.mxu0 %v2560_v19  ;;  %1128 = vmatpush.bf16.msrb.mxu1 %v2688_v20  ;;  %v3867_v19 = vld [vmem:[#allocation7 + $0x2cc] sm:$0xf0] }
  0xd1   :  { %1141 = vmatpush.bf16.msrb.mxu2 %v2816_v23  ;;  %1154 = vmatpush.bf16.msrb.mxu3 %v2944_v24  ;;  %v3364_v20 = vor.u32 %v3867_v19, %v3363_v18  ;;  %v3795_v23 = vld [vmem:[#allocation7 + $0x8c] sm:$0xf0]  ;;  %v3220_v24 = vor.u32 %v3831_v17, %v3219_v16  ;;  %v3237_v16 = vld [vmem:[#allocation7 + $0x1d0] sm:$0xf0]  ;;  %v3064_v18 = vor.u32 %v3789_v13, %v3061_v14  ;;  %v3299_v19 = vld [vmem:[#allocation7 + $0x240] sm:$0xf] }
  0xd2   :  { %v3076_v28 = vor.u32 %v3795_v23, %v3075_v22  ;;  %v3045_v22 = vld [vmem:[#allocation7 + $0x50] sm:$0xf0]  ;;  %v3857_v13 = vld [vmem:[#allocation7 + $0x284] sm:$0xf] }
  0xd4   :  { %1116 = vmatpush.bf16.msrb.mxu0 %v2544_v31  ;;  %1129 = vmatpush.bf16.msrb.mxu1 %v2672_v32  ;;  %v3823_v31 = vld [vmem:[#allocation7 + $0x16c] sm:$0xf0] }
  0xd5   :  { %1142 = vmatpush.bf16.msrb.mxu2 %v2800_v35  ;;  %1155 = vmatpush.bf16.msrb.mxu3 %v2928_v36  ;;  %v3188_v34 = vor.u32 %v3823_v31, %v3187_v30  ;;  %v3787_v35 = vld [vmem:[#allocation7 + $0x4c] sm:$0xf0]  ;;  %v3171_v36 = vld [vmem:[#allocation7 + $0x140] sm:$0xf]  ;;  %v3205_v30 = vld [vmem:[#allocation7 + $0x190] sm:$0xf0] }
  0xd6   :  { %v3044_v38 = vor.u32 %v3787_v35, %v3043_v33  ;;  %v3172_v40 = vor.u32 %v3819_v37, %v3171_v36  ;;  %v3777_v31 = vld [vmem:[#allocation7 + $0x4] sm:$0xf]  ;;  %v3267_v35 = vld [vmem:[#allocation7 + $0x200] sm:$0xf]  ;;  %v3843_v36 = vld [vmem:[#allocation7 + $0x20c] sm:$0xf0] }
  0xd7   :  { %v3507_v37 = vld [vmem:[#allocation7 + $0x3e0] sm:$0xf] }
  0xd8   :  { %1117 = vmatpush.bf16.msrb.mxu0 %v2528_v43  ;;  %1130 = vmatpush.bf16.msrb.mxu1 %v2656_v44  ;;  %v3815_v43 = vld [vmem:[#allocation7 + $0x12c] sm:$0xf0]  ;;  %v3028_v44 = vor.u32 %v3783_v41, %v3027_v39  ;;  %v3189_v41 = vld [vmem:[#allocation7 + $0x170] sm:$0xf0] }
  0xd9   :  { %1143 = vmatpush.bf16.msrb.mxu2 %v2784_v48  ;;  %1156 = vmatpush.bf16.msrb.mxu3 %v2912_v49  ;;  %v3156_v45 = vor.u32 %v3815_v43, %v3155_v42  ;;  %v3805_v48 = vld [vmem:[#allocation7 + $0xe4] sm:$0xf]  ;;  %v3125_v49 = vld [vmem:[#allocation7 + $0xf0] sm:$0xf0]  ;;  %v3903_v39 = vld [vmem:[#allocation7 + $0x3ec] sm:$0xf0] }
  0xda   :  { %v3128_v51 = vor.u32 %v3805_v48, %v3125_v49  ;;  %v3508_v42 = vor.u32 %v3903_v39, %v3507_v37  ;;  %v3899_v48 = vld [vmem:[#allocation7 + $0x3cc] sm:$0xf0]  ;;  %v3411_v37 = vld [vmem:[#allocation7 + $0x320] sm:$0xf] }
  0xdc   :  { %1118 = vmatpush.bf16.msrb.mxu0 %v2512_v63  ;;  %1131 = vmatpush.bf16.msrb.mxu1 %v2640_v0  ;;  %v3811_v63 = vld [vmem:[#allocation7 + $0x10c] sm:$0xf0]  ;;  %v3331_v0 = vld [vmem:[#allocation7 + $0x280] sm:$0xf] }
  0xdd   :  { %1144 = vmatpush.bf16.msrb.mxu2 %v2768_v1  ;;  %1157 = vmatpush.bf16.msrb.mxu3 %v2896_v2  ;;  %v3793_v1 = vld [vmem:[#allocation7 + $0x84] sm:$0xf]  ;;  %v3077_v2 = vld [vmem:[#allocation7 + $0x90] sm:$0xf0] }
  0xdf   :  { %1119 = vmatmul.bf16.vlgmr.msrb.gmra.mxu0 %v4187_v57  ;;  %1132 = vmatmul.bf16.vlgmr.msrb.gmra.mxu1 %v4189_v58  ;;  %v3827_v57 = vld [vmem:[#allocation7 + $0x18c] sm:$0xf0] }
  0xe0   :  { %1949 = vmatpush.bf16.msra.mxu0 %v3124_v3  ;;  %1962 = vmatpush.bf16.msra.mxu1 %v3252_v5  ;;  %v3863_v58 = vld [vmem:[#allocation7 + $0x2ac] sm:$0xf0]  ;;  %v3140_v3 = vor.u32 %v3811_v63, %v3139_v62  ;;  %v3332_v5 = vor.u32 %v3859_v4, %v3331_v0  ;;  %v3475_v62 = vld [vmem:[#allocation7 + $0x3a0] sm:$0xf] }
  0xe1   :  { %1145 = vmatmul.bf16.vlgmr.msrb.gmra.mxu2 %v4191_v59  ;;  %1158 = vmatmul.bf16.vlgmr.msrb.gmra.mxu3 %v4193_v60  ;;  %v3348_v27 = vor.u32 %v3863_v58, %v3347_v26  ;;  %v3059_v59 = vld [vmem:[#allocation7 + $0x60] sm:$0xf]  ;;  %v3204_v60 = vor.u32 %v3827_v57, %v3203_v25  ;;  %v3221_v25 = vld [vmem:[#allocation7 + $0x1b0] sm:$0xf0]  ;;  %v3895_v63 = vld [vmem:[#allocation7 + $0x3ac] sm:$0xf0] }
  0xe2   :  { %1975 = vmatpush.bf16.msra.mxu2 %v3380_v11  ;;  %v3060_v32 = vor.u32 %v3791_v29, %v3059_v59  ;;  %v3080_v11 = vor.u32 %v3793_v1, %v3077_v2  ;;  %v3283_v58 = vld [vmem:[#allocation7 + $0x220] sm:$0xf]  ;;  %v3029_v59 = vld [vmem:[#allocation7 + $0x30] sm:$0xf0]  ;;  %v3825_v29 = vld [vmem:[#allocation7 + $0x184] sm:$0xf]  ;;  %1988 = vmatpush.bf16.msra.mxu3 %v3508_v42  ;;  %v3476_v0 = vor.u32 %v3895_v63, %v3475_v62 }
  0xe3   :  { %v3208_v33 = vor.u32 %v3825_v29, %v3205_v30  ;;  %v3813_v1 = vld [vmem:[#allocation7 + $0x124] sm:$0xf]  ;;  %v3157_v2 = vld [vmem:[#allocation7 + $0x130] sm:$0xf0] }
  0xe4   :  { %1950 = vmatpush.bf16.msra.mxu0 %v3108_v12  ;;  %1963 = vmatpush.bf16.msra.mxu1 %v3236_v15  ;;  %v3316_v12 = vor.u32 %v3855_v10, %v3315_v8  ;;  %v3833_v15 = vld [vmem:[#allocation7 + $0x1c4] sm:$0xf]  ;;  %v3160_v4 = vor.u32 %v3813_v1, %v3157_v2  ;;  %v3459_v8 = vld [vmem:[#allocation7 + $0x380] sm:$0xf]  ;;  %v3301_v29 = vld [vmem:[#allocation7 + $0x250] sm:$0xf0] }
  0xe5   :  { %v3240_v17 = vor.u32 %v3833_v15, %v3237_v16  ;;  %v3509_v1 = vld [vmem:[#allocation7 + $0x3f0] sm:$0xf0] }
  0xe6   :  { %1976 = vmatpush.bf16.msra.mxu2 %v3364_v20  ;;  %v3851_v20 = vld [vmem:[#allocation7 + $0x24c] sm:$0xf0] }
  0xe7   :  { %v3300_v23 = vor.u32 %v3851_v20, %v3299_v19  ;;  %v3443_v20 = vld [vmem:[#allocation7 + $0x360] sm:$0xf] }
  0xe8   :  { %1951 = vmatpush.bf16.msra.mxu0 %v3092_v21  ;;  %1964 = vmatpush.bf16.msra.mxu1 %v3220_v24  ;;  %v3785_v21 = vld [vmem:[#allocation7 + $0x44] sm:$0xf] }
  0xe9   :  { %v3829_v24 = vld [vmem:[#allocation7 + $0x1a4] sm:$0xf]  ;;  %v3048_v26 = vor.u32 %v3785_v21, %v3045_v22  ;;  %v3887_v21 = vld [vmem:[#allocation7 + $0x36c] sm:$0xf0] }
  0xea   :  { %1977 = vmatpush.bf16.msra.mxu2 %v3348_v27  ;;  %v3224_v57 = vor.u32 %v3829_v24, %v3221_v25  ;;  %v3847_v27 = vld [vmem:[#allocation7 + $0x22c] sm:$0xf0]  ;;  %v3444_v22 = vor.u32 %v3887_v21, %v3443_v20  ;;  %v3317_v24 = vld [vmem:[#allocation7 + $0x270] sm:$0xf0] }
  0xec   :  { %1952 = vmatpush.bf16.msra.mxu0 %v3076_v28  ;;  %1965 = vmatpush.bf16.msra.mxu1 %v3204_v60  ;;  %v3781_v28 = vld [vmem:[#allocation7 + $0x24] sm:$0xf]  ;;  %v3284_v60 = vor.u32 %v3847_v27, %v3283_v58 }
  0xee   :  { %1978 = vmatpush.bf16.msra.mxu2 %v3332_v5  ;;  %v3349_v5 = vld [vmem:[#allocation7 + $0x2b0] sm:$0xf0] }
  0xf0   :  { %1953 = vmatpush.bf16.msra.mxu0 %v3060_v32  ;;  %1966 = vmatpush.bf16.msra.mxu1 %v3188_v34  ;;  %v3013_v32 = vld [vmem:[#allocation7 + $0x10] sm:$0xf0]  ;;  %v3032_v34 = vor.u32 %v3781_v28, %v3029_v59 }
  0xf1   :  { %v3016_v49 = vor.u32 %v3777_v31, %v3013_v32 }
  0xf2   :  { %1979 = vmatpush.bf16.msra.mxu2 %v3316_v12  ;;  %v3141_v12 = vld [vmem:[#allocation7 + $0x110] sm:$0xf0] }
  0xf4   :  { %1954 = vmatpush.bf16.msra.mxu0 %v3044_v38  ;;  %1967 = vmatpush.bf16.msra.mxu1 %v3172_v40  ;;  %v3268_v38 = vor.u32 %v3843_v36, %v3267_v35  ;;  %v3821_v40 = vld [vmem:[#allocation7 + $0x164] sm:$0xf]  ;;  %v3808_v36 = vld [vmem:[#allocation7 + $0xf4] sm:$0xf0] }
  0xf5   :  { %v3192_v43 = vor.u32 %v3821_v40, %v3189_v41  ;;  %v3845_v40 = vld [vmem:[#allocation7 + $0x224] sm:$0xf]  ;;  %v3285_v41 = vld [vmem:[#allocation7 + $0x230] sm:$0xf0] }
  0xf6   :  { %1980 = vmatpush.bf16.msra.mxu2 %v3300_v23  ;;  %v3853_v23 = vld [vmem:[#allocation7 + $0x264] sm:$0xf] }
  0xf7   :  { %v3320_v25 = vor.u32 %v3853_v23, %v3317_v24  ;;  %v3067_v23 = vld [vmem:[#allocation7 + $0x68] sm:$0xf] }
  0xf8   :  { %1955 = vmatpush.bf16.msra.mxu0 %v3028_v44  ;;  %1968 = vmatpush.bf16.msra.mxu1 %v3156_v45  ;;  %v3869_v44 = vld [vmem:[#allocation7 + $0x2e4] sm:$0xf]  ;;  %v3381_v45 = vld [vmem:[#allocation7 + $0x2f0] sm:$0xf0] }
  0xf9   :  { %v3384_v46 = vor.u32 %v3869_v44, %v3381_v45 }
  0xfa   :  { %1981 = vmatpush.bf16.msra.mxu2 %v3284_v60  ;;  %v3849_v60 = vld [vmem:[#allocation7 + $0x244] sm:$0xf] }
  0xfc   :  { %1956 = vmatpush.bf16.msra.mxu0 %v3012_v50  ;;  %1969 = vmatpush.bf16.msra.mxu1 %v3140_v3  ;;  %v3492_v50 = vor.u32 %v3899_v48, %v3491_v47  ;;  %v3861_v3 = vld [vmem:[#allocation7 + $0x2a4] sm:$0xf]  ;;  %v3804_v48 = vld [vmem:[#allocation7 + $0xd4] sm:$0xf0] }
  0xfd   :  { %v3352_v6 = vor.u32 %v3861_v3, %v3349_v5  ;;  %v3099_v5 = vld [vmem:[#allocation7 + $0xa8] sm:$0xf] }
  0xfe   :  { %1982 = vmatpush.bf16.msra.mxu2 %v3268_v38  ;;  %1989 = vmatpush.bf16.msra.mxu3 %v3492_v50  ;;  %v3879_v38 = vld [vmem:[#allocation7 + $0x32c] sm:$0xf0] }
  0xff   :  { %v3412_v39 = vor.u32 %v3879_v38, %v3411_v37  ;;  %v3875_v50 = vld [vmem:[#allocation7 + $0x30c] sm:$0xf0]  ;;  %v3885_v37 = vld [vmem:[#allocation7 + $0x364] sm:$0xf]  ;;  %v3445_v38 = vld [vmem:[#allocation7 + $0x370] sm:$0xf0] }
 0x100   :  { %2001 = vmatpush.bf16.msrb.mxu0 %v3128_v51  ;;  %2014 = vmatpush.bf16.msrb.mxu1 %v3256_v9  ;;  %v3817_v51 = vld [vmem:[#allocation7 + $0x144] sm:$0xf]  ;;  %v3891_v9 = vld [vmem:[#allocation7 + $0x38c] sm:$0xf0] }
 0x101   :  { %v3460_v10 = vor.u32 %v3891_v9, %v3459_v8  ;;  %v3493_v8 = vld [vmem:[#allocation7 + $0x3d0] sm:$0xf0] }
 0x102   :  { %2027 = vmatpush.bf16.msrb.mxu2 %v3384_v46  ;;  %1990 = vmatpush.bf16.msra.mxu3 %v3476_v0  ;;  %v3115_v46 = vld [vmem:[#allocation7 + $0xc8] sm:$0xf] }
 0x103   :  { %v3116_v2 = vor.u32 %v3804_v48, %v3115_v46  ;;  %v3227_v46 = vld [vmem:[#allocation7 + $0x1a8] sm:$0xf]  ;;  %v3832_v48 = vld [vmem:[#allocation7 + $0x1b4] sm:$0xf0] }
 0x104   :  { %2002 = vmatpush.bf16.msrb.mxu0 %v3112_v54  ;;  %2015 = vmatpush.bf16.msrb.mxu1 %v3240_v17  ;;  %v3176_v54 = vor.u32 %v3817_v51, %v3173_v52  ;;  %v3333_v17 = vld [vmem:[#allocation7 + $0x290] sm:$0xf0] }
 0x106   :  { %2028 = vmatpush.bf16.msrb.mxu2 %v3368_v56  ;;  %1991 = vmatpush.bf16.msra.mxu3 %v3460_v10  ;;  %v3901_v56 = vld [vmem:[#allocation7 + $0x3e4] sm:$0xf] }
 0x107   :  { %v3512_v3 = vor.u32 %v3901_v56, %v3509_v1  ;;  %v3780_v56 = vld [vmem:[#allocation7 + $0x14] sm:$0xf0] }
 0x108   :  { %2003 = vmatpush.bf16.msrb.mxu0 %v3096_v61  ;;  %2016 = vmatpush.bf16.msrb.mxu1 %v3224_v57  ;;  %v4214_v61 = vld [vmem:[%s4272_s4] sm:$0xf]  ;;  %v3427_v57 = vld [vmem:[#allocation7 + $0x340] sm:$0xf] }
 0x109   :  { %v307_v7 = vperm.slane %v4214_v61, 0  ;;  %v308_v45 = vperm.slane %v4214_v61, 1 }
 0x10a   :  { %2029 = vmatpush.bf16.msrb.mxu2 %v3352_v6  ;;  %1992 = vmatpush.bf16.msra.mxu3 %v3444_v22  ;;  %v3800_v6 = vld [vmem:[#allocation7 + $0xb4] sm:$0xf0] }
 0x10b   :  { %v3100_v10 = vor.u32 %v3800_v6, %v3099_v5 }
 0x10c   :  { %2004 = vmatpush.bf16.msrb.mxu0 %v3080_v11  ;;  %2017 = vmatpush.bf16.msrb.mxu1 %v3208_v33  ;;  %v3809_v11 = vld [vmem:[#allocation7 + $0x104] sm:$0xf]  ;;  %v3304_v33 = vor.u32 %v3849_v60, %v3301_v29  ;;  %v3051_v29 = vld [vmem:[#allocation7 + $0x48] sm:$0xf] }
 0x10d   :  { %v3144_v16 = vor.u32 %v3809_v11, %v3141_v12  ;;  %v3083_v12 = vld [vmem:[#allocation7 + $0x88] sm:$0xf] }
 0x110   :  { %2005 = vmatpush.bf16.msrb.mxu0 %v3064_v18  ;;  %2018 = vmatpush.bf16.msrb.mxu1 %v3192_v43  ;;  %v3336_v18 = vor.u32 %v3857_v13, %v3333_v17  ;;  %v3288_v43 = vor.u32 %v3845_v40, %v3285_v41  ;;  %v3796_v13 = vld [vmem:[#allocation7 + $0x94] sm:$0xf0]  ;;  %v3477_v17 = vld [vmem:[#allocation7 + $0x3b0] sm:$0xf0] }
 0x111   :  { %v3084_v22 = vor.u32 %v3796_v13, %v3083_v12 }
 0x112   :  { %2030 = vmatpush.bf16.msrb.mxu2 %v3336_v18 }
 0x114   :  { %2006 = vmatpush.bf16.msrb.mxu0 %v3048_v26  ;;  %2019 = vmatpush.bf16.msrb.mxu1 %v3176_v54  ;;  %v3883_v26 = vld [vmem:[#allocation7 + $0x34c] sm:$0xf0]  ;;  %v3841_v54 = vld [vmem:[#allocation7 + $0x204] sm:$0xf] }
 0x115   :  { %v3428_v59 = vor.u32 %v3883_v26, %v3427_v57  ;;  %v3272_v0 = vor.u32 %v3841_v54, %v3269_v55  ;;  %v3259_v57 = vld [vmem:[#allocation7 + $0x1e8] sm:$0xf]  ;;  %v3840_v26 = vld [vmem:[#allocation7 + $0x1f4] sm:$0xf0]  ;;  %v3228_v54 = vor.u32 %v3832_v48, %v3227_v46 }
 0x116   :  { %2031 = vmatpush.bf16.msrb.mxu2 %v3320_v25  ;;  %v3792_v25 = vld [vmem:[#allocation7 + $0x74] sm:$0xf0]  ;;  %v3260_v60 = vor.u32 %v3840_v26, %v3259_v57  ;;  %v3019_v55 = vld [vmem:[#allocation7 + $0x8] sm:$0xf] }
 0x117   :  { %1993 = vmatpush.bf16.msra.mxu3 %v3428_v59  ;;  %v3068_v59 = vor.u32 %v3792_v25, %v3067_v23  ;;  %v3397_v23 = vld [vmem:[#allocation7 + $0x310] sm:$0xf0]  ;;  %v3179_v26 = vld [vmem:[#allocation7 + $0x148] sm:$0xf]  ;;  %v3812_v48 = vld [vmem:[#allocation7 + $0x114] sm:$0xf0] }
 0x118   :  { %2007 = vmatpush.bf16.msrb.mxu0 %v3032_v34  ;;  %2020 = vmatpush.bf16.msrb.mxu1 %v3160_v4  ;;  %v3131_v34 = vld [vmem:[#allocation7 + $0xe8] sm:$0xf] }
 0x119   :  { %v3132_v44 = vor.u32 %v3808_v36, %v3131_v34  ;;  %v3147_v46 = vld [vmem:[#allocation7 + $0x108] sm:$0xf] }
 0x11a   :  { %2032 = vmatpush.bf16.msrb.mxu2 %v3304_v33  ;;  %v3836_v33 = vld [vmem:[#allocation7 + $0x1d4] sm:$0xf0] }
 0x11b   :  { %v964_v14 = vpop.f32.mrf.mxu0  ;;  %v977_v15 = vpop.f32.mrf.mxu1  ;;  %1994 = vmatpush.bf16.msra.mxu3 %v3412_v39  ;;  %v309_v39 = vperm.slane %v4214_v61, 2 }
 0x11c   :  { %2008 = vmatpush.bf16.msrb.mxu0 %v3016_v49  ;;  %v965_v19 = vadd.f32 %v964_v14, %v307_v7  ;;  %2021 = vmatpush.bf16.msrb.mxu1 %v3144_v16  ;;  %v3395_v49 = vld [vmem:[#allocation7 + $0x300] sm:$0xf]  ;;  %v3897_v7 = vld [vmem:[#allocation7 + $0x3c4] sm:$0xf] }
 0x11d   :  { %v3396_v53 = vor.u32 %v3875_v50, %v3395_v49  ;;  %v3496_v9 = vor.u32 %v3897_v7, %v3493_v8  ;;  %v3893_v16 = vld [vmem:[#allocation7 + $0x3a4] sm:$0xf]  ;;  %v3448_v49 = vor.u32 %v3885_v37, %v3445_v38  ;;  %v3020_v8 = vor.u32 %v3780_v56, %v3019_v55  ;;  %v3163_v37 = vld [vmem:[#allocation7 + $0x128] sm:$0xf]  ;;  %v3816_v38 = vld [vmem:[#allocation7 + $0x134] sm:$0xf0] }
 0x11e   :  { %v978_v58 = vadd.f32 %v977_v15, %v965_v19  ;;  %2033 = vmatpush.bf16.msrb.mxu2 %v3288_v43  ;;  %v3480_v21 = vor.u32 %v3893_v16, %v3477_v17  ;;  %v3881_v50 = vld [vmem:[#allocation7 + $0x344] sm:$0xf]  ;;  %v3387_v17 = vld [vmem:[#allocation7 + $0x2e8] sm:$0xf]  ;;  %v3860_v55 = vld [vmem:[#allocation7 + $0x294] sm:$0xf0]  ;;  %v3148_v56 = vor.u32 %v3812_v48, %v3147_v46 }
 0x11f   :  { %1995 = vmatpush.bf16.msra.mxu3 %v3396_v53 }
 0x122   :  { %v990_v27 = vpop.f32.mrf.mxu2  ;;  %v1003_v28 = vpop.f32.mrf.mxu3  ;;  %2034 = vmatpush.bf16.msrb.mxu2 %v3272_v0  ;;  %v3806_v0 = vld [vmem:[#allocation7 + $0xec] sm:$0xf] }
 0x123   :  { %v991_v30 = vadd.f32 %v990_v27, %v978_v58  ;;  %v966_v31 = vpop.f32.mrf.mxu0  ;;  %v979_v32 = vpop.f32.mrf.mxu1  ;;  %2040 = vmatpush.bf16.msrb.mxu3 %v3512_v3  ;;  %v3889_v58 = vld [vmem:[#allocation7 + $0x384] sm:$0xf]  ;;  %v3461_v27 = vld [vmem:[#allocation7 + $0x390] sm:$0xf0] }
 0x124   :  { %v3788_v31 = vld [vmem:[#allocation7 + $0x54] sm:$0xf0]  ;;  %v3243_v32 = vld [vmem:[#allocation7 + $0x1c8] sm:$0xf]  ;;  %v3464_v34 = vor.u32 %v3889_v58, %v3461_v27  ;;  %v3877_v3 = vld [vmem:[#allocation7 + $0x324] sm:$0xf] }
 0x125   :  { %v1004_v35 = vadd.f32 %v1003_v28, %v991_v30  ;;  %v3052_v40 = vor.u32 %v3788_v31, %v3051_v29  ;;  %v3244_v41 = vor.u32 %v3836_v33, %v3243_v32  ;;  %v3820_v58 = vld [vmem:[#allocation7 + $0x154] sm:$0xf0]  ;;  %v3371_v31 = vld [vmem:[#allocation7 + $0x2c8] sm:$0xf] }
 0x126   :  { %v3868_v32 = vld [vmem:[#allocation7 + $0x2d4] sm:$0xf0] }
 0x127   :  { %v1163_v42 = vmax.f32 %v1004_v35, 0.0  ;;  %2041 = vmatpush.bf16.msrb.mxu3 %v3496_v9 }
 0x129   :  { %v4218_v47 = vpack.c.bf16 %v1163_v42, %v1163_v42  ;;  %v3035_v42 = vld [vmem:[#allocation7 + $0x28] sm:$0xf] }
 0x12a   :  { %v992_v51 = vpop.f32.mrf.mxu2  ;;  %v1005_v52 = vpop.f32.mrf.mxu3 }
 0x12b   :  { %1957 = vmatmul.bf16.vlgmr.msra.gmra.mxu0 %v4218_v47  ;;  %v1016_v62 = vpop.f32.mrf.mxu0  ;;  %v1029_v63 = vpop.f32.mrf.mxu1  ;;  %2042 = vmatpush.bf16.msrb.mxu3 %v3480_v21  ;;  %v3429_v51 = vld [vmem:[#allocation7 + $0x350] sm:$0xf0]  ;;  %v3872_v21 = vld [vmem:[#allocation7 + $0x2f4] sm:$0xf0] }
 0x12c   :  { %2053 = vmatpush.bf16.msra.mxu0 %v3132_v44  ;;  %v1017_v4 = vadd.f32 %v1016_v62, %v308_v45  ;;  %v3784_v45 = vld [vmem:[#allocation7 + $0x34] sm:$0xf0]  ;;  %v3211_v62 = vld [vmem:[#allocation7 + $0x188] sm:$0xf]  ;;  %v3432_v1 = vor.u32 %v3881_v50, %v3429_v51  ;;  %v3388_v27 = vor.u32 %v3872_v21, %v3387_v17  ;;  %v3069_v51 = vld [vmem:[#allocation7 + $0x78] sm:$0xf0] }
 0x12d   :  { %v3036_v53 = vor.u32 %v3784_v45, %v3035_v42  ;;  %v3355_v42 = vld [vmem:[#allocation7 + $0x2a8] sm:$0xf]  ;;  %v3830_v17 = vld [vmem:[#allocation7 + $0x1ac] sm:$0xf] }
 0x12e   :  { %v1030_v11 = vadd.f32 %v1029_v63, %v1017_v4  ;;  %v3828_v63 = vld [vmem:[#allocation7 + $0x194] sm:$0xf0]  ;;  %v3413_v4 = vld [vmem:[#allocation7 + $0x330] sm:$0xf0] }
 0x12f   :  { %2043 = vmatpush.bf16.msrb.mxu3 %v3464_v34  ;;  %v3212_v9 = vor.u32 %v3828_v63, %v3211_v62  ;;  %v3416_v16 = vor.u32 %v3877_v3, %v3413_v4  ;;  %v3053_v3 = vld [vmem:[#allocation7 + $0x58] sm:$0xf0]  ;;  %v3856_v4 = vld [vmem:[#allocation7 + $0x274] sm:$0xf0] }
 0x130   :  { %2054 = vmatpush.bf16.msra.mxu0 %v3116_v2  ;;  %v3133_v2 = vld [vmem:[#allocation7 + $0xf8] sm:$0xf0] }
 0x131   :  { %v3136_v13 = vor.u32 %v3806_v0, %v3133_v2  ;;  %v3786_v2 = vld [vmem:[#allocation7 + $0x4c] sm:$0xf] }
 0x132   :  { %v1042_v14 = vpop.f32.mrf.mxu2  ;;  %v1055_v15 = vpop.f32.mrf.mxu3 }
 0x133   :  { %v1043_v18 = vadd.f32 %v1042_v14, %v1030_v11  ;;  %v1018_v19 = vpop.f32.mrf.mxu0  ;;  %v1031_v20 = vpop.f32.mrf.mxu1  ;;  %2044 = vmatpush.bf16.msrb.mxu3 %v3448_v49  ;;  %v3195_v14 = vld [vmem:[#allocation7 + $0x168] sm:$0xf]  ;;  %v3790_v49 = vld [vmem:[#allocation7 + $0x6c] sm:$0xf] }
 0x134   :  { %2055 = vmatpush.bf16.msra.mxu0 %v3100_v10  ;;  %v3117_v19 = vld [vmem:[#allocation7 + $0xd8] sm:$0xf0]  ;;  %v3072_v62 = vor.u32 %v3790_v49, %v3069_v51  ;;  %v3499_v49 = vld [vmem:[#allocation7 + $0x3c8] sm:$0xf] }
 0x135   :  { %v1056_v24 = vadd.f32 %v1055_v15, %v1043_v18  ;;  %v3824_v15 = vld [vmem:[#allocation7 + $0x174] sm:$0xf0]  ;;  %v3802_v18 = vld [vmem:[#allocation7 + $0xcc] sm:$0xf] }
 0x136   :  { %v3120_v57 = vor.u32 %v3802_v18, %v3117_v19  ;;  %v3229_v18 = vld [vmem:[#allocation7 + $0x1b8] sm:$0xf0] }
 0x137   :  { %v1164_v28 = vmax.f32 %v1056_v24, 0.0  ;;  %2045 = vmatpush.bf16.msrb.mxu3 %v3432_v1  ;;  %v3196_v24 = vor.u32 %v3824_v15, %v3195_v14  ;;  %v3323_v1 = vld [vmem:[#allocation7 + $0x268] sm:$0xf]  ;;  %v3782_v14 = vld [vmem:[#allocation7 + $0x2c] sm:$0xf]  ;;  %v3232_v21 = vor.u32 %v3830_v17, %v3229_v18 }
 0x138   :  { %2056 = vmatpush.bf16.msra.mxu0 %v3084_v22  ;;  %v3873_v22 = vld [vmem:[#allocation7 + $0x304] sm:$0xf]  ;;  %v3037_v15 = vld [vmem:[#allocation7 + $0x38] sm:$0xf0] }
 0x139   :  { %v4221_v30 = vpack.c.bf16 %v1164_v28, %v1164_v28  ;;  %v3798_v28 = vld [vmem:[#allocation7 + $0xac] sm:$0xf] }
 0x13a   :  { %v1044_v35 = vpop.f32.mrf.mxu2  ;;  %v1057_v36 = vpop.f32.mrf.mxu3 }
 0x13b   :  { %1970 = vmatmul.bf16.vlgmr.msra.gmra.mxu1 %v4221_v30  ;;  %2009 = vmatmul.bf16.vlgmr.msrb.gmra.mxu0 %v4218_v47  ;;  %v3180_v35 = vor.u32 %v3820_v58, %v3179_v26  ;;  %v3213_v26 = vld [vmem:[#allocation7 + $0x198] sm:$0xf0] }
 0x13c   :  { %2057 = vmatpush.bf16.msra.mxu0 %v3068_v59  ;;  %2066 = vmatpush.bf16.msra.mxu1 %v3260_v60  ;;  %v1068_v43 = vpop.f32.mrf.mxu0  ;;  %v1081_v44 = vpop.f32.mrf.mxu1  ;;  %v3101_v59 = vld [vmem:[#allocation7 + $0xb8] sm:$0xf0]  ;;  %v3400_v60 = vor.u32 %v3873_v22, %v3397_v23  ;;  %v3291_v22 = vld [vmem:[#allocation7 + $0x228] sm:$0xf]  ;;  %v3778_v23 = vld [vmem:[#allocation7 + $0xc] sm:$0xf] }
 0x13d   :  { %v1069_v52 = vadd.f32 %v1068_v43, %v309_v39  ;;  %2046 = vmatpush.bf16.msrb.mxu3 %v3416_v16  ;;  %v3104_v36 = vor.u32 %v3798_v28, %v3101_v59  ;;  %v3372_v39 = vor.u32 %v3868_v32, %v3371_v31  ;;  %v3864_v43 = vld [vmem:[#allocation7 + $0x2b4] sm:$0xf0] }
 0x13e   :  { %v3356_v50 = vor.u32 %v3864_v43, %v3355_v42  ;;  %v3852_v16 = vld [vmem:[#allocation7 + $0x254] sm:$0xf0]  ;;  %v3870_v42 = vld [vmem:[#allocation7 + $0x2ec] sm:$0xf]  ;;  %v3389_v43 = vld [vmem:[#allocation7 + $0x2f8] sm:$0xf0] }
 0x13f   :  { %v1082_v5 = vadd.f32 %v1081_v44, %v1069_v52  ;;  %v3164_v44 = vor.u32 %v3816_v38, %v3163_v37  ;;  %v3838_v52 = vld [vmem:[#allocation7 + $0x1ec] sm:$0xf]  ;;  %v3515_v37 = vld [vmem:[#allocation7 + $0x3e8] sm:$0xf]  ;;  %v3392_v51 = vor.u32 %v3870_v42, %v3389_v43 }
 0x140   :  { %2058 = vmatpush.bf16.msra.mxu0 %v3052_v40  ;;  %2067 = vmatpush.bf16.msra.mxu1 %v3244_v41  ;;  %v3794_v40 = vld [vmem:[#allocation7 + $0x8c] sm:$0xf]  ;;  %v3085_v41 = vld [vmem:[#allocation7 + $0x98] sm:$0xf0] }
 0x141   :  { %2047 = vmatpush.bf16.msrb.mxu3 %v3400_v60  ;;  %v3088_v45 = vor.u32 %v3794_v40, %v3085_v41  ;;  %v3822_v40 = vld [vmem:[#allocation7 + $0x16c] sm:$0xf]  ;;  %v3197_v41 = vld [vmem:[#allocation7 + $0x178] sm:$0xf0] }
 0x142   :  { %v3200_v48 = vor.u32 %v3822_v40, %v3197_v41  ;;  %v3517_v40 = vld [vmem:[#allocation7 + $0x3f8] sm:$0xf0]  ;;  %v3898_v43 = vld [vmem:[#allocation7 + $0x3cc] sm:$0xf] }
 0x144   :  { %2059 = vmatpush.bf16.msra.mxu0 %v3036_v53  ;;  %2068 = vmatpush.bf16.msra.mxu1 %v3228_v54  ;;  %v1070_v11 = vpop.f32.mrf.mxu0  ;;  %v1083_v12 = vpop.f32.mrf.mxu1  ;;  %v3261_v53 = vld [vmem:[#allocation7 + $0x1f8] sm:$0xf0]  ;;  %v3339_v54 = vld [vmem:[#allocation7 + $0x288] sm:$0xf] }
 0x145   :  { %v1094_v6 = vpop.f32.mrf.mxu2  ;;  %v1107_v7 = vpop.f32.mrf.mxu3  ;;  %v3264_v63 = vor.u32 %v3838_v52, %v3261_v53  ;;  %v3340_v0 = vor.u32 %v3860_v55, %v3339_v54  ;;  %v3324_v11 = vor.u32 %v3856_v4, %v3323_v1  ;;  %v3900_v52 = vld [vmem:[#allocation7 + $0x3d4] sm:$0xf0]  ;;  %v3818_v53 = vld [vmem:[#allocation7 + $0x14c] sm:$0xf]  ;;  %v3181_v54 = vld [vmem:[#allocation7 + $0x158] sm:$0xf0] }
 0x146   :  { %v1095_v10 = vadd.f32 %v1094_v6, %v1082_v5  ;;  %v3834_v5 = vld [vmem:[#allocation7 + $0x1cc] sm:$0xf]  ;;  %v3245_v6 = vld [vmem:[#allocation7 + $0x1d8] sm:$0xf0]  ;;  %v3184_v1 = vor.u32 %v3818_v53, %v3181_v54  ;;  %v3896_v4 = vld [vmem:[#allocation7 + $0x3b4] sm:$0xf0] }
 0x147   :  { %v3248_v12 = vor.u32 %v3834_v5, %v3245_v6  ;;  %v3165_v5 = vld [vmem:[#allocation7 + $0x138] sm:$0xf0]  ;;  %v3862_v6 = vld [vmem:[#allocation7 + $0x2ac] sm:$0xf] }
 0x148   :  { %v1108_v20 = vadd.f32 %v1107_v7, %v1095_v10  ;;  %2060 = vmatpush.bf16.msra.mxu0 %v3020_v8  ;;  %2069 = vmatpush.bf16.msra.mxu1 %v3212_v9  ;;  %v310_v7 = vperm.slane %v4214_v61, 3  ;;  %v3056_v8 = vor.u32 %v3786_v2, %v3053_v3  ;;  %v3040_v61 = vor.u32 %v3782_v14, %v3037_v15  ;;  %v3483_v2 = vld [vmem:[#allocation7 + $0x3a8] sm:$0xf]  ;;  %v3149_v14 = vld [vmem:[#allocation7 + $0x118] sm:$0xf0] }
 0x149   :  { %v3858_v15 = vld [vmem:[#allocation7 + $0x28c] sm:$0xf] }
 0x14a   :  { %v1165_v25 = vmax.f32 %v1108_v20, 0.0  ;;  %v3886_v54 = vld [vmem:[#allocation7 + $0x36c] sm:$0xf] }
 0x14b   :  { %2022 = vmatmul.bf16.vlgmr.msrb.gmra.mxu1 %v4221_v30  ;;  %2061 = vmatmul.bf16.vlgmr.msra.gmra.mxu0 %v4218_v47 }
 0x14c   :  { %2105 = vmatpush.bf16.msrb.mxu0 %v3136_v13  ;;  %v4226_v29 = vpack.c.bf16 %v1165_v25, %v1165_v25  ;;  %2070 = vmatpush.bf16.msra.mxu1 %v3196_v24  ;;  %v3307_v13 = vld [vmem:[#allocation7 + $0x248] sm:$0xf]  ;;  %v3021_v24 = vld [vmem:[#allocation7 + $0x18] sm:$0xf0]  ;;  %v3848_v25 = vld [vmem:[#allocation7 + $0x234] sm:$0xf0] }
 0x14d   :  { %v1096_v33 = vpop.f32.mrf.mxu2  ;;  %v1109_v34 = vpop.f32.mrf.mxu3  ;;  %v3308_v20 = vor.u32 %v3852_v16, %v3307_v13  ;;  %v3024_v59 = vor.u32 %v3778_v23, %v3021_v24  ;;  %v3810_v13 = vld [vmem:[#allocation7 + $0x10c] sm:$0xf]  ;;  %v3341_v16 = vld [vmem:[#allocation7 + $0x298] sm:$0xf0] }
 0x14e   :  { %1983 = vmatmul.bf16.vlgmr.msra.gmra.mxu2 %v4226_v29  ;;  %v3292_v33 = vor.u32 %v3848_v25, %v3291_v22  ;;  %v3152_v18 = vor.u32 %v3810_v13, %v3149_v14  ;;  %v3325_v22 = vld [vmem:[#allocation7 + $0x278] sm:$0xf0]  ;;  %v3435_v25 = vld [vmem:[#allocation7 + $0x348] sm:$0xf] }
 0x14f   :  { %2079 = vmatpush.bf16.msra.mxu2 %v3388_v27  ;;  %v3909_v14 = vld [vmem:[#allocation10 + $0x20] sm:$0xff] }
 0x150   :  { %2106 = vmatpush.bf16.msrb.mxu0 %v3120_v57  ;;  %2071 = vmatpush.bf16.msra.mxu1 %v3180_v35  ;;  %v3826_v57 = vld [vmem:[#allocation7 + $0x18c] sm:$0xf]  ;;  %v3275_v35 = vld [vmem:[#allocation7 + $0x208] sm:$0xf] }
 0x151   :  { %v3216_v34 = vor.u32 %v3826_v57, %v3213_v26  ;;  %v3884_v57 = vld [vmem:[#allocation7 + $0x354] sm:$0xf0]  ;;  %v3850_v26 = vld [vmem:[#allocation7 + $0x24c] sm:$0xf] }
 0x153   :  { %2080 = vmatpush.bf16.msra.mxu2 %v3372_v39  ;;  %v3904_v39 = vld [vmem:[#allocation7 + $0x3f4] sm:$0xf0] }
 0x154   :  { %2107 = vmatpush.bf16.msrb.mxu0 %v3104_v36  ;;  %2072 = vmatpush.bf16.msra.mxu1 %v3164_v44  ;;  %v3844_v36 = vld [vmem:[#allocation7 + $0x214] sm:$0xf0]  ;;  %v3516_v46 = vor.u32 %v3904_v39, %v3515_v37  ;;  %v3842_v37 = vld [vmem:[#allocation7 + $0x20c] sm:$0xf] }
 0x155   :  { %v3902_v39 = vld [vmem:[#allocation7 + $0x3ec] sm:$0xf] }
 0x156   :  { %v3520_v42 = vor.u32 %v3902_v39, %v3517_v40  ;;  %v3923_v40 = vld [vmem:[#allocation10 + $0x90] sm:$0xff] }
 0x157   :  { %2081 = vmatpush.bf16.msra.mxu2 %v3356_v50 }
 0x158   :  { %2108 = vmatpush.bf16.msrb.mxu0 %v3088_v45  ;;  %2073 = vmatpush.bf16.msra.mxu1 %v3148_v56  ;;  %v3276_v45 = vor.u32 %v3844_v36, %v3275_v35  ;;  %v3403_v35 = vld [vmem:[#allocation7 + $0x308] sm:$0xf]  ;;  %v3876_v36 = vld [vmem:[#allocation7 + $0x314] sm:$0xf0] }
 0x15b   :  { %2082 = vmatpush.bf16.msra.mxu2 %v3340_v0  ;;  %2074 = vmatmul.bf16.vlgmr.msra.gmra.mxu1 %v4221_v30  ;;  %v3500_v0 = vor.u32 %v3900_v52, %v3499_v49  ;;  %v3469_v52 = vld [vmem:[#allocation7 + $0x398] sm:$0xf0] }
 0x15c   :  { %2109 = vmatpush.bf16.msrb.mxu0 %v3072_v62  ;;  %2118 = vmatpush.bf16.msrb.mxu1 %v3264_v63  ;;  %v1120_v9 = vpop.f32.mrf.mxu0  ;;  %v1133_v10 = vpop.f32.mrf.mxu1  ;;  %v3866_v62 = vld [vmem:[#allocation7 + $0x2cc] sm:$0xf]  ;;  %v3373_v63 = vld [vmem:[#allocation7 + $0x2d8] sm:$0xf0] }
 0x15d   :  { %v1121_v19 = vadd.f32 %v1120_v9, %v310_v7  ;;  %v3376_v3 = vor.u32 %v3866_v62, %v3373_v63  ;;  %v3357_v7 = vld [vmem:[#allocation7 + $0x2b8] sm:$0xf0]  ;;  %v3882_v62 = vld [vmem:[#allocation7 + $0x34c] sm:$0xf] }
 0x15e   :  { %2035 = vmatmul.bf16.vlgmr.msrb.gmra.mxu2 %v4226_v29  ;;  %v3437_v63 = vld [vmem:[#allocation7 + $0x358] sm:$0xf0] }
 0x15f   :  { %2083 = vmatpush.bf16.msra.mxu2 %v3324_v11  ;;  %v1134_v58 = vadd.f32 %v1133_v10, %v1121_v19  ;;  %v3467_v10 = vld [vmem:[#allocation7 + $0x388] sm:$0xf]  ;;  %v3360_v11 = vor.u32 %v3862_v6, %v3357_v7  ;;  %v3344_v19 = vor.u32 %v3858_v15, %v3341_v16  ;;  %v3912_v7 = vld [vmem:[#allocation10 + $0x38] sm:$0xff] }
 0x160   :  { %2110 = vmatpush.bf16.msrb.mxu0 %v3056_v8  ;;  %2119 = vmatpush.bf16.msrb.mxu1 %v3248_v12  ;;  %v3484_v8 = vor.u32 %v3896_v4, %v3483_v2  ;;  %v3892_v12 = vld [vmem:[#allocation7 + $0x394] sm:$0xf0]  ;;  %v3421_v2 = vld [vmem:[#allocation7 + $0x338] sm:$0xf0]  ;;  %v3874_v4 = vld [vmem:[#allocation7 + $0x30c] sm:$0xf] }
 0x161   :  { %v3468_v17 = vor.u32 %v3892_v12, %v3467_v10  ;;  %v3911_v10 = vld [vmem:[#allocation10 + $0x30] sm:$0xff]  ;;  %v3920_v15 = vld [vmem:[#allocation10 + $0x78] sm:$0xff] }
 0x162   :  { %v3908_v16 = vld [vmem:[#allocation10 + $0x18] sm:$0xff] }
 0x163   :  { %2084 = vmatpush.bf16.msra.mxu2 %v3308_v20  ;;  %v3888_v20 = vld [vmem:[#allocation7 + $0x374] sm:$0xf0] }
 0x164   :  { %v1146_v27 = vpop.f32.mrf.mxu2  ;;  %v1159_v28 = vpop.f32.mrf.mxu3  ;;  %2111 = vmatpush.bf16.msrb.mxu0 %v3040_v61  ;;  %2120 = vmatpush.bf16.msrb.mxu1 %v3232_v21  ;;  %v3451_v61 = vld [vmem:[#allocation7 + $0x368] sm:$0xf]  ;;  %v3854_v21 = vld [vmem:[#allocation7 + $0x26c] sm:$0xf] }
 0x165   :  { %v1147_v60 = vadd.f32 %v1146_v27, %v1134_v58  ;;  %v1122_v31 = vpop.f32.mrf.mxu0  ;;  %v1135_v32 = vpop.f32.mrf.mxu1  ;;  %v3452_v23 = vor.u32 %v3888_v20, %v3451_v61  ;;  %v3328_v24 = vor.u32 %v3854_v21, %v3325_v22  ;;  %v3309_v58 = vld [vmem:[#allocation7 + $0x258] sm:$0xf0]  ;;  %v3436_v27 = vor.u32 %v3884_v57, %v3435_v25  ;;  %v3906_v61 = vld [vmem:[#allocation10 + $0x8] sm:$0xff] }
 0x166   :  { %v3846_v31 = vld [vmem:[#allocation7 + $0x22c] sm:$0xf]  ;;  %v3293_v32 = vld [vmem:[#allocation7 + $0x238] sm:$0xf0] }
 0x167   :  { %v1160_v38 = vadd.f32 %v1159_v28, %v1147_v60  ;;  %2085 = vmatpush.bf16.msra.mxu2 %v3292_v33  ;;  %v3312_v28 = vor.u32 %v3850_v26, %v3309_v58  ;;  %v3880_v60 = vld [vmem:[#allocation7 + $0x334] sm:$0xf0]  ;;  %v3918_v20 = vld [vmem:[#allocation10 + $0x68] sm:$0xff]  ;;  %v3916_v57 = vld [vmem:[#allocation10 + $0x58] sm:$0xff] }
 0x168   :  { %2112 = vmatpush.bf16.msrb.mxu0 %v3024_v59  ;;  %2121 = vmatpush.bf16.msrb.mxu1 %v3216_v34  ;;  %v3419_v59 = vld [vmem:[#allocation7 + $0x328] sm:$0xf]  ;;  %v3296_v34 = vor.u32 %v3846_v31, %v3293_v32  ;;  %v3928_v26 = vld [vmem:[#allocation10 + $0xb8] sm:$0xff]  ;;  %v3926_v31 = vld [vmem:[#allocation10 + $0xa8] sm:$0xff] }
 0x169   :  { %v1166_v44 = vmax.f32 %v1160_v38, 0.0  ;;  %v3420_v33 = vor.u32 %v3880_v60, %v3419_v59  ;;  %v3277_v38 = vld [vmem:[#allocation7 + $0x218] sm:$0xf0]  ;;  %v3927_v59 = vld [vmem:[#allocation10 + $0xb0] sm:$0xff]  ;;  %v3914_v60 = vld [vmem:[#allocation10 + $0x48] sm:$0xff] }
 0x16a   :  { %v3280_v41 = vor.u32 %v3842_v37, %v3277_v38  ;;  %v3924_v38 = vld [vmem:[#allocation10 + $0x98] sm:$0xff] }
 0x16b   :  { %v4234_v50 = vpack.c.bf16 %v1166_v44, %v1166_v44  ;;  %2113 = vmatmul.bf16.vlgmr.msrb.gmra.mxu0 %v4218_v47  ;;  %2086 = vmatpush.bf16.msra.mxu2 %v3276_v45  ;;  %v3814_v47 = vld [vmem:[#allocation7 + $0x12c] sm:$0xf]  ;;  %v3501_v44 = vld [vmem:[#allocation7 + $0x3d8] sm:$0xf0] }
 0x16c   :  { %v1148_v55 = vpop.f32.mrf.mxu2  ;;  %v1161_v56 = vpop.f32.mrf.mxu3  ;;  %2122 = vmatpush.bf16.msrb.mxu1 %v3200_v48  ;;  %v3168_v9 = vor.u32 %v3814_v47, %v3165_v5  ;;  %v3504_v45 = vor.u32 %v3898_v43, %v3501_v44  ;;  %v3485_v48 = vld [vmem:[#allocation7 + $0x3b8] sm:$0xf0]  ;;  %2425 = vmatpush.bf16.msra.mxu0 %v3912_v7  ;;  %v3922_v44 = vld [vmem:[#allocation10 + $0x88] sm:$0xff] }
 0x16d   :  { %1996 = vmatmul.bf16.vlgmr.msra.gmra.mxu3 %v4234_v50  ;;  %v3453_v55 = vld [vmem:[#allocation7 + $0x378] sm:$0xf0] }
 0x16e   :  { %2092 = vmatpush.bf16.msra.mxu3 %v3516_v46  ;;  %2087 = vmatmul.bf16.vlgmr.msra.gmra.mxu2 %v4226_v29  ;;  %v3894_v46 = vld [vmem:[#allocation7 + $0x3ac] sm:$0xf]  ;;  %v3456_v56 = vor.u32 %v3886_v54, %v3453_v55 }
 0x16f   :  { %2131 = vmatpush.bf16.msrb.mxu2 %v3392_v51  ;;  %v3488_v49 = vor.u32 %v3894_v46, %v3485_v48  ;;  %v3890_v51 = vld [vmem:[#allocation7 + $0x38c] sm:$0xf] }
 0x170   :  { %2123 = vmatpush.bf16.msrb.mxu1 %v3184_v1  ;;  %v3472_v53 = vor.u32 %v3890_v51, %v3469_v52  ;;  %v3878_v1 = vld [vmem:[#allocation7 + $0x32c] sm:$0xf]  ;;  %2426 = vmatpush.bf16.msra.mxu0 %v3911_v10  ;;  %v3921_v52 = vld [vmem:[#allocation10 + $0x80] sm:$0xff] }
 0x172   :  { %2093 = vmatpush.bf16.msra.mxu3 %v3500_v0  ;;  %v3440_v0 = vor.u32 %v3882_v62, %v3437_v63  ;;  %v3934_v63 = vld [vmem:[#allocation10 + $0xe8] sm:$0xff] }
 0x173   :  { %2132 = vmatpush.bf16.msrb.mxu2 %v3376_v3  ;;  %v3424_v3 = vor.u32 %v3878_v1, %v3421_v2 }
 0x174   :  { %2124 = vmatpush.bf16.msrb.mxu1 %v3168_v9 }
 0x176   :  { %2094 = vmatpush.bf16.msra.mxu3 %v3484_v8 }
 0x177   :  { %2133 = vmatpush.bf16.msrb.mxu2 %v3360_v11  ;;  %v3910_v11 = vld [vmem:[#allocation10 + $0x28] sm:$0xff] }
 0x178   :  { %2125 = vmatpush.bf16.msrb.mxu1 %v3152_v18  ;;  %2427 = vmatpush.bf16.msra.mxu0 %v3910_v11  ;;  %v3907_v18 = vld [vmem:[#allocation10 + $0x10] sm:$0xff] }
 0x179   :  { %v3931_v11 = vld [vmem:[#allocation10 + $0xd0] sm:$0xff] }
 0x17a   :  { %2095 = vmatpush.bf16.msra.mxu3 %v3468_v17 }
 0x17b   :  { %2134 = vmatpush.bf16.msrb.mxu2 %v3344_v19  ;;  %2126 = vmatmul.bf16.vlgmr.msrb.gmra.mxu1 %v4221_v30  ;;  %v3404_v30 = vor.u32 %v3876_v36, %v3403_v35  ;;  %v3919_v19 = vld [vmem:[#allocation10 + $0x70] sm:$0xff]  ;;  %v3925_v35 = vld [vmem:[#allocation10 + $0xa0] sm:$0xff]  ;;  %v4252_v36 = vld [vmem:[#allocation8] sm:$0xf] }
 0x17c   :  { %2428 = vmatpush.bf16.msra.mxu0 %v3909_v14  ;;  %2438 = vmatpush.bf16.msra.mxu1 %v3920_v15  ;;  %v1301_v37 = vperm.slane %v4252_v36, 0  ;;  %v1302_v55 = vperm.slane %v4252_v36, 1  ;;  %v3930_v14 = vld [vmem:[#allocation10 + $0xc8] sm:$0xff] }
 0x17d   :  { %2048 = vmatmul.bf16.vlgmr.msrb.gmra.mxu3 %v4234_v50 }
 0x17e   :  { %2096 = vmatpush.bf16.msra.mxu3 %v3452_v23  ;;  %v3905_v23 = vld [vmem:[#allocation10] sm:$0xff] }
 0x17f   :  { %2135 = vmatpush.bf16.msrb.mxu2 %v3328_v24  ;;  %v3917_v24 = vld [vmem:[#allocation10 + $0x60] sm:$0xff] }
 0x180   :  { %2429 = vmatpush.bf16.msra.mxu0 %v3908_v16  ;;  %2439 = vmatpush.bf16.msra.mxu1 %v3919_v19 }
 0x182   :  { %2097 = vmatpush.bf16.msra.mxu3 %v3436_v27 }
 0x183   :  { %2136 = vmatpush.bf16.msrb.mxu2 %v3312_v28  ;;  %v3915_v28 = vld [vmem:[#allocation10 + $0x50] sm:$0xff] }
 0x184   :  { %2430 = vmatpush.bf16.msra.mxu0 %v3907_v18  ;;  %2440 = vmatpush.bf16.msra.mxu1 %v3918_v20 }
 0x186   :  { %2098 = vmatpush.bf16.msra.mxu3 %v3420_v33 }
 0x187   :  { %2137 = vmatpush.bf16.msrb.mxu2 %v3296_v34  ;;  %v3913_v34 = vld [vmem:[#allocation10 + $0x40] sm:$0xff] }
 0x188   :  { %2431 = vmatpush.bf16.msra.mxu0 %v3906_v61  ;;  %2441 = vmatpush.bf16.msra.mxu1 %v3917_v24  ;;  %v1304_v24 = vperm.slane %v4252_v36, 3 }
 0x18a   :  { %2099 = vmatpush.bf16.msra.mxu3 %v3404_v30 }
 0x18b   :  { %2138 = vmatpush.bf16.msrb.mxu2 %v3280_v41 }
 0x18c   :  { %2432 = vmatpush.bf16.msra.mxu0 %v3905_v23  ;;  %2442 = vmatpush.bf16.msra.mxu1 %v3916_v57 }
 0x18d   :  { %2100 = vmatmul.bf16.vlgmr.msra.gmra.mxu3 %v4234_v50 }
 0x18e   :  { %2144 = vmatpush.bf16.msrb.mxu3 %v3520_v42  ;;  %2139 = vmatmul.bf16.vlgmr.msrb.gmra.mxu2 %v4226_v29  ;;  %v3405_v29 = vld [vmem:[#allocation7 + $0x318] sm:$0xf0] }
 0x18f   :  { %v3408_v47 = vor.u32 %v3874_v4, %v3405_v29  ;;  %2451 = vmatpush.bf16.msra.mxu2 %v3928_v26  ;;  %v3933_v4 = vld [vmem:[#allocation10 + $0xe0] sm:$0xff] }
 0x190   :  { %2443 = vmatpush.bf16.msra.mxu1 %v3915_v28 }
 0x192   :  { %2145 = vmatpush.bf16.msrb.mxu3 %v3504_v45 }
 0x193   :  { %2452 = vmatpush.bf16.msra.mxu2 %v3927_v59 }
 0x194   :  { %2444 = vmatpush.bf16.msra.mxu1 %v3914_v60 }
 0x196   :  { %2146 = vmatpush.bf16.msrb.mxu3 %v3488_v49 }
 0x197   :  { %2453 = vmatpush.bf16.msra.mxu2 %v3926_v31 }
 0x198   :  { %2445 = vmatpush.bf16.msra.mxu1 %v3913_v34 }
 0x19a   :  { %2147 = vmatpush.bf16.msrb.mxu3 %v3472_v53  ;;  %v3936_v53 = vld [vmem:[#allocation10 + $0xf8] sm:$0xff] }
 0x19b   :  { %2454 = vmatpush.bf16.msra.mxu2 %v3925_v35 }
 0x19e   :  { %2148 = vmatpush.bf16.msrb.mxu3 %v3456_v56  ;;  %v3935_v56 = vld [vmem:[#allocation10 + $0xf0] sm:$0xff] }
 0x19f   :  { %2455 = vmatpush.bf16.msra.mxu2 %v3924_v38 }
 0x1a2   :  { %2149 = vmatpush.bf16.msrb.mxu3 %v3440_v0 }
 0x1a3   :  { %2456 = vmatpush.bf16.msra.mxu2 %v3923_v40 }
 0x1a6   :  { %2150 = vmatpush.bf16.msrb.mxu3 %v3424_v3 }
 0x1a7   :  { %2457 = vmatpush.bf16.msra.mxu2 %v3922_v44 }
 0x1a8   :  { %v1958_v5 = vpop.f32.mrf.mxu0 }
 0x1a9   :  { %v1959_v30 = vadd.f32 %v1958_v5, %v1301_v37  ;;  %v3951_v37 = vld [vmem:[%s4276_s8] ss:$0 sm:$0xff] }
 0x1aa   :  { %2151 = vmatpush.bf16.msrb.mxu3 %v3408_v47 }
 0x1ab   :  { %2458 = vmatpush.bf16.msra.mxu2 %v3921_v52 }
 0x1ad   :  { %2152 = vmatmul.bf16.vlgmr.msrb.gmra.mxu3 %v4234_v50 }
 0x1ae   :  { %2464 = vmatpush.bf16.msra.mxu3 %v3936_v53 }
 0x1b0   :  { %v1960_v6 = vpop.f32.mrf.mxu0 }
 0x1b1   :  { %v3932_v6 = vld [vmem:[#allocation10 + $0xd8] sm:$0xff] }
 0x1b2   :  { %2465 = vmatpush.bf16.msra.mxu3 %v3935_v56 }
 0x1b6   :  { %2466 = vmatpush.bf16.msra.mxu3 %v3934_v63 }
 0x1b8   :  { %v1971_v8 = vpop.f32.mrf.mxu1  ;;  %v4244_v9 = vpop.f32.mrf.mxu0 }
 0x1b9   :  { %v1972_v42 = vadd.f32 %v1971_v8, %v1959_v30  ;;  %v2011_v1 = vadd.f32 %v4244_v9, %v1302_v55 }
 0x1ba   :  { %2467 = vmatpush.bf16.msra.mxu3 %v3933_v4 }
 0x1be   :  { %2468 = vmatpush.bf16.msra.mxu3 %v3932_v6 }
 0x1c0   :  { %v1973_v12 = vpop.f32.mrf.mxu1  ;;  %v2012_v13 = vpop.f32.mrf.mxu0 }
 0x1c1   :  { %v1303_v12 = vperm.slane %v4252_v36, 2 }
 0x1c2   :  { %2469 = vmatpush.bf16.msra.mxu3 %v3931_v11 }
 0x1c6   :  { %2470 = vmatpush.bf16.msra.mxu3 %v3930_v14 }
 0x1c8   :  { %v4246_v50 = vpop.f32.mrf.mxu1  ;;  %v4248_v17 = vpop.f32.mrf.mxu0 }
 0x1c9   :  { %v2024_v3 = vadd.f32 %v4246_v50, %v2011_v1  ;;  %v2063_v9 = vadd.f32 %v4248_v17, %v1303_v12  ;;  %v3929_v50 = vld [vmem:[#allocation10 + $0xc0] sm:$0xff] }
 0x1ca   :  { %2471 = vmatpush.bf16.msra.mxu3 %v3929_v50 }
 0x1d0   :  { %v2025_v22 = vpop.f32.mrf.mxu1  ;;  %v2064_v25 = vpop.f32.mrf.mxu0 }
 0x1d1   :  { %v1984_v21 = vpop.f32.mrf.mxu2 }
 0x1d2   :  { %v1985_v43 = vadd.f32 %v1984_v21, %v1972_v42 }
 0x1d8   :  { %v4250_v27 = vpop.f32.mrf.mxu1 }
 0x1d9   :  { %v1986_v58 = vpop.f32.mrf.mxu2  ;;  %v2076_v15 = vadd.f32 %v4250_v27, %v2063_v9 }
 0x1e0   :  { %v2077_v33 = vpop.f32.mrf.mxu1 }
 0x1e1   :  { %v2036_v32 = vpop.f32.mrf.mxu2 }
 0x1e2   :  { %v2037_v29 = vadd.f32 %v2036_v32, %v2024_v3 }
 0x1e8   :  { %v2114_v39 = vpop.f32.mrf.mxu0 }
 0x1e9   :  { %v2038_v41 = vpop.f32.mrf.mxu2  ;;  %v2115_v25 = vadd.f32 %v2114_v39, %v1304_v24 }
 0x1f0   :  { %v1997_v45 = vpop.f32.mrf.mxu3  ;;  %v2116_v46 = vpop.f32.mrf.mxu0 }
 0x1f1   :  { %v1998_v48 = vadd.f32 %v1997_v45, %v1985_v43  ;;  %v2088_v51 = vpop.f32.mrf.mxu2 }
 0x1f2   :  { %v2089_v16 = vadd.f32 %v2088_v51, %v2076_v15 }
 0x1f3   :  { %v2157_v49 = vmax.f32 %v1998_v48, 0.0 }
 0x1f5   :  { %v2161_v54 = vpack.c.bf16 %v2157_v49, %v2157_v49 }
 0x1f7   :  { %2433 = vmatmul.bf16.vlgmr.msra.gmra.mxu0 %v2161_v54 }
 0x1f8   :  { %v1999_v62 = vpop.f32.mrf.mxu3  ;;  %v2127_v0 = vpop.f32.mrf.mxu1 }
 0x1f9   :  { %v2090_v2 = vpop.f32.mrf.mxu2  ;;  %v2128_v57 = vadd.f32 %v2127_v0, %v2115_v25 }
 0x200   :  { %v2049_v47 = vpop.f32.mrf.mxu3  ;;  %v2129_v7 = vpop.f32.mrf.mxu1 }
 0x201   :  { %v2050_v5 = vadd.f32 %v2049_v47, %v2037_v29 }
 0x203   :  { %v2158_v8 = vmax.f32 %v2050_v5, 0.0 }
 0x205   :  { %v2162_v10 = vpack.c.bf16 %v2158_v8, %v2158_v8 }
 0x207   :  { %2446 = vmatmul.bf16.vlgmr.msra.gmra.mxu1 %v2162_v10 }
 0x208   :  { %v2051_v13 = vpop.f32.mrf.mxu3 }
 0x210   :  { %v2101_v18 = vpop.f32.mrf.mxu3 }
 0x211   :  { %v2102_v19 = vadd.f32 %v2101_v18, %v2089_v16  ;;  %v2140_v61 = vpop.f32.mrf.mxu2 }
 0x212   :  { %v2141_v17 = vadd.f32 %v2140_v61, %v2128_v57 }
 0x213   :  { %v2159_v20 = vmax.f32 %v2102_v19, 0.0 }
 0x215   :  { %v2163_v21 = vpack.c.bf16 %v2159_v20, %v2159_v20 }
 0x217   :  { %2459 = vmatmul.bf16.vlgmr.msra.gmra.mxu2 %v2163_v21 }
 0x218   :  { %v2103_v22 = vpop.f32.mrf.mxu3 }
 0x219   :  { %v2142_v23 = vpop.f32.mrf.mxu2 }
 0x230   :  { %v2153_v26 = vpop.f32.mrf.mxu3 }
 0x231   :  { %v2154_v58 = vadd.f32 %v2153_v26, %v2141_v17 }
 0x233   :  { %v2160_v27 = vmax.f32 %v2154_v58, 0.0 }
 0x235   :  { %v2164_v28 = vpack.c.bf16 %v2160_v27, %v2160_v27 }
 0x237   :  { %2472 = vmatmul.bf16.vlgmr.msra.gmra.mxu3 %v2164_v28 }
 0x238   :  { %v2155_v59 = vpop.f32.mrf.mxu3 }
 0x274   :  { %v2434_v60 = vpop.f32.mrf.mxu0 }
 0x275   :  { %v2435_v36 = vadd.f32 %v3951_v37, %v2434_v60 }
 0x27c   :  { %v2436_v31 = vpop.f32.mrf.mxu0 }
 0x284   :  { %v2447_v32 = vpop.f32.mrf.mxu1 }
 0x285   :  { %v2448_v38 = vadd.f32 %v2447_v32, %v2435_v36 }
 0x28c   :  { %v2449_v33 = vpop.f32.mrf.mxu1 }
 0x29a   :  { %v2460_v34 = vpop.f32.mrf.mxu2 }
 0x29b   :  { %v2461_v39 = vadd.f32 %v2460_v34, %v2448_v38 }
 0x2a2   :  { %v2462_v35 = vpop.f32.mrf.mxu2 }
 0x2ba   :  { %v2473_v40 = vpop.f32.mrf.mxu3 }
 0x2bb   :  { %v2474_v30 = vadd.f32 %v2473_v40, %v2461_v39 }
 0x2bd   :  { %2477 = vst [vmem:[#allocation11] sm:$0xff] %v2474_v30 }
 0x2be   :  { %2488 = dma.vmem_to_hbm [thread:$0]  %s2484_s18, 128, %s2486_s21, [#allocation4]  }
 0x2c2   :  { %v2475_v41 = vpop.f32.mrf.mxu3 }
 0x2c3   :  { %4102 = dma.done.wait [#allocation4], 128  }
 0x2c4   :  { %4103 = vsyncadd [#allocation4], 4294967168 }
 0x2c5   :  { %2493 = vsyncpa [#allocation3], 1 }
 0x2c6   :  { %2494 = vsyncpa [#allocation6], 1 }
 0x2c7   :  { %2495 = vsyncpa [#allocation9], 1 }
 0x2c8   :  { %2496 = vsyncpa [#allocation4], 1 }

</bundles_post_ra>
